<compile_context>
chip_gen: v7x
topology: tpu7x:2x2x1
jax: 0.10.0
libtpu: 0.0.40
codegen_flags: <defaults>
</compile_context>

<pallas_src>
import functools
import math

import jax
import jax.numpy as jnp
from jax.experimental import pallas as pl
from jax.experimental.pallas import tpu as pltpu


def _vmem_limit_bytes():
    """Generation-aware scoped-VMEM limit (headroom below physical capacity)."""
    try:
        cap = pltpu.get_tpu_info().vmem_capacity_bytes
    except Exception:  # pragma: no cover - conservative fallback
        cap = 128 * 1024 * 1024
    if cap <= 64 * 1024 * 1024:          # v7x-class TensorCore (64 MiB)
        return 40 * 1024 * 1024
    return 100 * 1024 * 1024             # v5e / v6e (128 MiB)


def _pick_tile(n, targets=(1024, 512, 256, 128)):
    """Largest lane-friendly tile that divides n, else the full (untiled) axis."""
    for t in targets:
        if n % t == 0:
            return t
    return n


def _pick_batch_block(batch, seq, target_rows=256, max_rows=1024):
    """Pick TB | batch so TB*seq reaches the MXU fill target without blowing VMEM."""
    best = 1
    for tb in range(1, batch + 1):
        if batch % tb:
            continue
        if tb * seq <= max_rows:
            best = tb
        if best * seq >= target_rows:
            break
    # v7x megacore: keep the batch grid length >= 2 when it does not hurt MXU fill.
    if batch // best == 1 and best % 2 == 0 and (best // 2) * seq >= target_rows:
        best //= 2
    return best


def _layer_norm(x, w, b, eps):
    mu = jnp.mean(x, axis=-1, keepdims=True)
    var = jnp.mean((x - mu) ** 2, axis=-1, keepdims=True)
    return (x - mu) * jax.lax.rsqrt(var + eps) * w + b


# --------------------------------------------------------------------------
# Stage 2: transformer encoder -> user representation
#   grid = (batch_blocks, num_layers); activations carried in VMEM across layers.
# --------------------------------------------------------------------------
def transformer_kernel(num_heads,
                       pre_ref,                 # (TB, S, P) bf16 gathered pretrained rows
                       ids_ref,                 # (TB, 1, S) int32 (key-padding mask)
                       pos_ref,                 # (S, H) f32
                       proj_w_ref, proj_b_ref,  # (P, H) bf16 / (1, H) f32
                       qkv_w_ref,               # (1, 3, H, H) bf16 (this layer)
                       qkv_b_ref,               # (1, 3, 1, H) f32
                       out_w_ref,               # (1, H, H) bf16
                       out_b_ref,               # (1, 1, H) f32
                       norm1_w_ref, norm1_b_ref,
                       ffn1_w_ref, ffn1_b_ref,
                       ffn2_w_ref, ffn2_b_ref,
                       norm2_w_ref, norm2_b_ref,
                       final_w_ref, final_b_ref,   # (1, H)
                       user_ref,                # (TB, 1, H) f32 output block
                       xbuf):                   # (TB*S, H) f32 VMEM scratch (carried)
    l = pl.program_id(1)
    TB, S, P = pre_ref.shape
    H = xbuf.shape[-1]
    hd = H // num_heads
    scale = 1.0 / math.sqrt(hd)

    # ---- first layer step: project the gathered rows, add positional embedding ----
    @pl.when(l == 0)
    def _():
        x0 = jnp.dot(pre_ref[...].reshape(TB * S, P), proj_w_ref[...],
                     preferred_element_type=jnp.float32) + proj_b_ref[...]
        x0 = x0.reshape(TB, S, H) + pos_ref[...][None, :, :]
        xbuf[...] = x0.reshape(TB * S, H)
        # dropout -> identity (inference)

    pad = ids_ref[...] == 0                      # (TB, 1, S): True at padded keys

    x = xbuf[...]                                # (TB*S, H) f32
    xb = x.astype(jnp.bfloat16)

    # Lane-dense fused projections on the whole (TB*S, H) operand (one per q/k/v).
    q = jnp.dot(xb, qkv_w_ref[0, 0], preferred_element_type=jnp.float32) + qkv_b_ref[0, 0]
    k = jnp.dot(xb, qkv_w_ref[0, 1], preferred_element_type=jnp.float32) + qkv_b_ref[0, 1]
    v = jnp.dot(xb, qkv_w_ref[0, 2], preferred_element_type=jnp.float32) + qkv_b_ref[0, 2]
    q = (q * scale).astype(jnp.bfloat16).reshape(TB, S, H)   # fold 1/sqrt(hd) once
    k = k.astype(jnp.bfloat16).reshape(TB, S, H)
    v = v.astype(jnp.bfloat16).reshape(TB, S, H)

    ctx_heads = []
    for h in range(num_heads):
        sl = slice(h * hd, (h + 1) * hd)
        scores = jnp.einsum('bqd,bkd->bqk', q[:, :, sl], k[:, :, sl],
                            preferred_element_type=jnp.float32)       # (TB, S, S)
        # Only the key-padding mask is applied (faithful to the reference forward,
        # which never passes the tril attention_mask to the encoder layers).
        scores = jnp.where(pad, -1e9, scores)
        m = jnp.max(scores, axis=-1, keepdims=True)
        p = jnp.exp(scores - m)
        attn = p * pl.reciprocal(jnp.sum(p, axis=-1, keepdims=True), approx=True)
        ctx_heads.append(jnp.einsum('bqk,bkd->bqd',
                                    attn.astype(jnp.bfloat16), v[:, :, sl],
                                    preferred_element_type=jnp.float32))
    ctx = jnp.concatenate(ctx_heads, axis=-1).reshape(TB * S, H)

    attn_out = jnp.dot(ctx.astype(jnp.bfloat16), out_w_ref[0],
                       preferred_element_type=jnp.float32) + out_b_ref[0]

    # Post-norm residual blocks (nn.TransformerEncoderLayer defaults, eps=1e-5).
    x = _layer_norm(x + attn_out, norm1_w_ref[0], norm1_b_ref[0], 1e-5)
    ff = jnp.maximum(jnp.dot(x.astype(jnp.bfloat16), ffn1_w_ref[0],
                             preferred_element_type=jnp.float32) + ffn1_b_ref[0], 0.0)
    ff = jnp.dot(ff.astype(jnp.bfloat16), ffn2_w_ref[0],
                 preferred_element_type=jnp.float32) + ffn2_b_ref[0]
    x = _layer_norm(x + ff, norm2_w_ref[0], norm2_b_ref[0], 1e-5)
    xbuf[...] = x

    @pl.when(l == pl.num_programs(1) - 1)
    def _():
        # Left-padded sequences: most recent item is the last position.
        last = x.reshape(TB, S, H)[:, S - 1, :]                        # (TB, H)
        user = _layer_norm(last, final_w_ref[...], final_b_ref[...], 1e-6)
        user_ref[...] = user.reshape(TB, 1, H)


def encode_users(params, item_seq, *, num_layers, num_heads):
    B, S = item_seq.shape
    P, H = params['proj_w'].shape
    L = num_layers
    TB = _pick_batch_block(B, S)
    nb = B // TB

    # Gather the (small) per-sequence pretrained rows with plain XLA; the bulk item
    # table never enters this kernel.  Projection is linear, so projecting the gathered
    # rows inside the kernel equals gathering projected rows.
    pre_seq = jnp.take(params['emb_table'], item_seq, axis=0)          # (B, S, P) bf16
    ids3 = item_seq.reshape(B, 1, S)

    vmem = pl.BlockSpec(memory_space=pltpu.MemorySpace.VMEM)
    kernel = functools.partial(transformer_kernel, num_heads)

    in_specs = [
        pl.BlockSpec((TB, S, P), lambda b, l: (b, 0, 0)),        # pre_seq (batch block)
        pl.BlockSpec((TB, 1, S), lambda b, l: (b, 0, 0)),        # ids (pad mask)
        vmem,                                                    # pos_emb
        vmem, vmem,                                              # proj_w, proj_b
        pl.BlockSpec((1, 3, H, H), lambda b, l: (l, 0, 0, 0)),   # qkv_w  (per layer)
        pl.BlockSpec((1, 3, 1, H), lambda b, l: (l, 0, 0, 0)),   # qkv_b
        pl.BlockSpec((1, H, H), lambda b, l: (l, 0, 0)),         # out_w
        pl.BlockSpec((1, 1, H), lambda b, l: (l, 0, 0)),         # out_b
        pl.BlockSpec((1, 1, H), lambda b, l: (l, 0, 0)),         # norm1_w
        pl.BlockSpec((1, 1, H), lambda b, l: (l, 0, 0)),         # norm1_b
        pl.BlockSpec((1, H, H), lambda b, l: (l, 0, 0)),         # ffn1_w
        pl.BlockSpec((1, 1, H), lambda b, l: (l, 0, 0)),         # ffn1_b
        pl.BlockSpec((1, H, H), lambda b, l: (l, 0, 0)),         # ffn2_w
        pl.BlockSpec((1, 1, H), lambda b, l: (l, 0, 0)),         # ffn2_b
        pl.BlockSpec((1, 1, H), lambda b, l: (l, 0, 0)),         # norm2_w
        pl.BlockSpec((1, 1, H), lambda b, l: (l, 0, 0)),         # norm2_b
        vmem, vmem,                                              # final_ln_w, final_ln_b
    ]

    flops = int(B * L * (2 * 6 * S * H * H + 4 * S * S * H) + 2 * B * S * P * H)
    cost = pl.CostEstimate(
        flops=flops,
        transcendentals=int(B * L * num_heads * S * S),
        bytes_accessed=int(nb * 6 * L * H * H * 2 + B * S * P * 2 + B * H * 4))

    user = pl.pallas_call(
        kernel,
        grid=(nb, L),
        in_specs=in_specs,
        out_specs=pl.BlockSpec((TB, 1, H), lambda b, l: (b, 0, 0)),
        out_shape=jax.ShapeDtypeStruct((B, 1, H), jnp.float32),
        scratch_shapes=[pltpu.VMEM((TB * S, H), jnp.float32)],
        compiler_params=pltpu.CompilerParams(
            dimension_semantics=("parallel", "arbitrary"),   # batch parallel, layers carried
            vmem_limit_bytes=_vmem_limit_bytes()),
        cost_estimate=cost,
    )(pre_seq, ids3, params['pos_emb'][:S],
      params['proj_w'], params['proj_b'],
      params['qkv_w'], params['qkv_b'], params['out_w'], params['out_b'],
      params['norm1_w'], params['norm1_b'],
      params['ffn1_w'], params['ffn1_b'], params['ffn2_w'], params['ffn2_b'],
      params['norm2_w'], params['norm2_b'],
      params['final_ln_w'], params['final_ln_b'])
    return user.reshape(B, H)


# --------------------------------------------------------------------------
# Stage 3 (fused with Stage 1): logits = user @ (emb_tile @ proj_w + proj_b).T per N-tile
# --------------------------------------------------------------------------
def logits_kernel(user_ref, emb_ref, w_ref, b_ref, out_ref):
    items = jnp.dot(emb_ref[...], w_ref[...],
                    preferred_element_type=jnp.float32) + b_ref[...]        # (tn, H) f32
    out_ref[...] = jax.lax.dot_general(
        user_ref[...], items.astype(jnp.bfloat16),
        (((1,), (1,)), ((), ())), preferred_element_type=jnp.float32)       # (B, tn)


def compute_logits(user_rep, emb_table, proj_w, proj_b):
    B, H = user_rep.shape
    N, P = emb_table.shape
    tn = _pick_tile(N)
    n_tiles = N // tn
    if n_tiles >= 4:
        # Deeper pipeline for the streamed item tiles (narrow (tn,P) bf16 transfers).
        emb_spec = pl.BlockSpec((tn, P), lambda j: (j, 0), pipeline_mode=pl.Buffered(3))
    else:
        emb_spec = pl.BlockSpec((tn, P), lambda j: (j, 0))
    return pl.pallas_call(
        logits_kernel,
        grid=(n_tiles,),
        in_specs=[pl.BlockSpec((B, H), lambda j: (0, 0)),        # user rep (grid-constant)
                  emb_spec,                                      # bf16 item-table tile
                  pl.BlockSpec(memory_space=pltpu.MemorySpace.VMEM),   # proj_w
                  pl.BlockSpec(memory_space=pltpu.MemorySpace.VMEM)],  # proj_b
        out_specs=pl.BlockSpec((B, tn), lambda j: (0, j)),       # lane-dense output tile
        out_shape=jax.ShapeDtypeStruct((B, N), jnp.float32),
        compiler_params=pltpu.CompilerParams(
            dimension_semantics=("parallel",),
            vmem_limit_bytes=_vmem_limit_bytes()),
        cost_estimate=pl.CostEstimate(
            flops=2 * N * P * H + 2 * B * N * H, transcendentals=0,
            bytes_accessed=N * P * 2 + P * H * 2 + B * H * 2 + B * N * 4),
    )(user_rep.astype(jnp.bfloat16), emb_table, proj_w, proj_b)


# --------------------------------------------------------------------------
# Full forward
# --------------------------------------------------------------------------
def sasrec_forward(params, item_seq, *, num_layers, num_heads):
    user_rep = encode_users(params, item_seq,
                            num_layers=num_layers, num_heads=num_heads)
    return compute_logits(user_rep, params['emb_table'],
                          params['proj_w'], params['proj_b'])


def init_params(key, *, num_items, pretrained_dim, hidden_units,
                max_seq_length, num_layers, num_heads):
    H, P, L = hidden_units, pretrained_dim, num_layers
    ks = jax.random.split(key, 12)

    def nrm(k, shape, s=0.1, dtype=jnp.float32):
        return (s * jax.random.normal(k, shape)).astype(dtype)

    bf = jnp.bfloat16
    return {
        'emb_table':  nrm(ks[0], (num_items, P), dtype=bf),      # frozen pretrained table
        'proj_w':     nrm(ks[1], (P, H), dtype=bf),              # (in, out)
        'proj_b':     nrm(ks[2], (1, H), 0.01),
        'pos_emb':    nrm(ks[3], (max_seq_length, H)),
        'qkv_w':      nrm(ks[4], (L, 3, H, H), dtype=bf),        # fused lane-dense q/k/v
        'qkv_b':      nrm(ks[5], (L, 3, 1, H), 0.01),
        'out_w':      nrm(ks[6], (L, H, H), dtype=bf),
        'out_b':      jnp.zeros((L, 1, H), jnp.float32),
        'norm1_w':    jnp.ones((L, 1, H), jnp.float32),
        'norm1_b':    jnp.zeros((L, 1, H), jnp.float32),
        'ffn1_w':     nrm(ks[7], (L, H, H), dtype=bf),           # dim_feedforward == H
        'ffn1_b':     nrm(ks[8], (L, 1, H), 0.01),
        'ffn2_w':     nrm(ks[9], (L, H, H), dtype=bf),
        'ffn2_b':     nrm(ks[10], (L, 1, H), 0.01),
        'norm2_w':    jnp.ones((L, 1, H), jnp.float32),
        'norm2_b':    jnp.zeros((L, 1, H), jnp.float32),
        'final_ln_w': jnp.ones((1, H), jnp.float32),
        'final_ln_b': jnp.zeros((1, H), jnp.float32),
    }


if __name__ == "__main__":
    # Small, module-consistent config.
    hidden_units = 32
    max_seq_length = 16
    num_heads = 2
    num_layers = 2
    num_items = 64          # size of the pretrained item-embedding table
    pretrained_dim = 16
    batch, seq_len = 2, 8

    key = jax.random.PRNGKey(0)
    pkey, dkey = jax.random.split(key)
    params = init_params(pkey,
                         num_items=num_items, pretrained_dim=pretrained_dim,
                         hidden_units=hidden_units, max_seq_length=max_seq_length,
                         num_layers=num_layers, num_heads=num_heads)
    item_seq = jax.random.randint(dkey, (batch, seq_len), 0, num_items,
                                  dtype=jnp.int32)

    fwd = jax.jit(functools.partial(sasrec_forward,
                                    num_layers=num_layers, num_heads=num_heads))
    logits = jax.block_until_ready(fwd(params, item_seq))
    assert logits.shape == (batch, num_items)
    assert bool(jnp.all(jnp.isfinite(logits)))
    print("KERNEL_OK")
</pallas_src>

<mosaic_0001>
module attributes {stable_mosaic.version = 11 : i64} {
  func.func @logits_kernel(%arg0: i32, %arg1: memref<2x32xbf16, #tpu.memory_space<vmem>>, %arg2: memref<64x16xbf16, #tpu.memory_space<vmem>>, %arg3: memref<16x32xbf16, #tpu.memory_space<vmem>>, %arg4: memref<1x32xf32, #tpu.memory_space<vmem>>, %arg5: memref<2x64xf32, #tpu.memory_space<vmem>>) attributes {dimension_semantics = [#tpu.dimension_semantics<parallel>], iteration_bounds = array<i64: 1>, scalar_prefetch = 0 : i64, scratch_operands = 0 : i64, tpu.core_type = #tpu.core_type<tc>, window_params = [{pipeline_mode = #tpu.pipeline_mode<synchronous>, transform_indices = @transform_0, window_bounds = array<i64: 2, 32>}, {transform_indices = @transform_1, window_bounds = array<i64: 64, 16>}, {pipeline_mode = #tpu.pipeline_mode<synchronous>, transform_indices = @transform_2, window_bounds = array<i64: 16, 32>}, {pipeline_mode = #tpu.pipeline_mode<synchronous>, transform_indices = @transform_3, window_bounds = array<i64: 1, 32>}, {transform_indices = @transform_4, window_bounds = array<i64: 2, 64>}]} {
    %c0 = arith.constant 0 : index
    %c0_0 = arith.constant 0 : index
    %0 = vector.load %arg2[%c0, %c0_0] : memref<64x16xbf16, #tpu.memory_space<vmem>>, vector<64x16xbf16>
    %c0_1 = arith.constant 0 : index
    %c0_2 = arith.constant 0 : index
    %1 = vector.load %arg3[%c0_1, %c0_2] : memref<16x32xbf16, #tpu.memory_space<vmem>>, vector<16x32xbf16>
    %cst = arith.constant dense<0.000000e+00> : vector<64x32xf32>
    %2 = tpu.matmul %0, %1, %cst {dimension_numbers = #tpu.dot_dimension_numbers<[1], [0], [0], [1], [0, 0, 1, 1], [], []>} : vector<64x16xbf16>, vector<16x32xbf16>, vector<64x32xf32> -> vector<64x32xf32>
    %c0_3 = arith.constant 0 : index
    %c0_4 = arith.constant 0 : index
    %3 = vector.load %arg4[%c0_3, %c0_4] : memref<1x32xf32, #tpu.memory_space<vmem>>, vector<1x32xf32>
    %4 = vector.broadcast %3 : vector<1x32xf32> to vector<64x32xf32>
    %5 = arith.addf %2, %4 : vector<64x32xf32>
    %c0_5 = arith.constant 0 : index
    %c0_6 = arith.constant 0 : index
    %6 = vector.load %arg1[%c0_5, %c0_6] : memref<2x32xbf16, #tpu.memory_space<vmem>>, vector<2x32xbf16>
    %7 = arith.truncf %5 : vector<64x32xf32> to vector<64x32xbf16>
    %cst_7 = arith.constant dense<0.000000e+00> : vector<2x64xf32>
    %8 = tpu.matmul %6, %7, %cst_7 {dimension_numbers = #tpu.dot_dimension_numbers<[1], [1], [0], [0], [0, 0, 1, 0], [], []>} : vector<2x32xbf16>, vector<64x32xbf16>, vector<2x64xf32> -> vector<2x64xf32>
    %c0_8 = arith.constant 0 : index
    %c0_9 = arith.constant 0 : index
    %9 = vector.load %arg5[%c0_8, %c0_9] : memref<2x64xf32, #tpu.memory_space<vmem>>, vector<2x64xf32>
    tpu.vector_store %arg5[%c0_8, %c0_9], %8 {strides = array<i32>} : memref<2x64xf32, #tpu.memory_space<vmem>>, vector<2x64xf32>,
    return
  }
  func.func @transform_0(%arg0: i32) -> (i32, i32) {
    %c0_i32 = arith.constant 0 : i32
    %c0_i32_0 = arith.constant 0 : i32
    %c0_i32_1 = arith.constant 0 : i32
    return %c0_i32, %c0_i32_0 : i32, i32
  }
  func.func @transform_1(%arg0: i32) -> (i32, i32) {
    %c0_i32 = arith.constant 0 : i32
    %c0_i32_0 = arith.constant 0 : i32
    return %arg0, %c0_i32 : i32, i32
  }
  func.func @transform_2(%arg0: i32) -> (i32, i32) {
    %c0_i32 = arith.constant 0 : i32
    %c0_i32_0 = arith.constant 0 : i32
    %c0_i32_1 = arith.constant 0 : i32
    return %c0_i32, %c0_i32_0 : i32, i32
  }
  func.func @transform_3(%arg0: i32) -> (i32, i32) {
    %c0_i32 = arith.constant 0 : i32
    %c0_i32_0 = arith.constant 0 : i32
    %c0_i32_1 = arith.constant 0 : i32
    return %c0_i32, %c0_i32_0 : i32, i32
  }
  func.func @transform_4(%arg0: i32) -> (i32, i32) {
    %c0_i32 = arith.constant 0 : i32
    %c0_i32_0 = arith.constant 0 : i32
    return %c0_i32, %arg0 : i32, i32
  }
}

module attributes {stable_mosaic.version = 11 : i64} {
  func.func @transformer_kernel(%arg0: i32, %arg1: i32, %arg2: memref<2x8x16xbf16, #tpu.memory_space<vmem>>, %arg3: memref<2x1x8xi32, #tpu.memory_space<vmem>>, %arg4: memref<8x32xf32, #tpu.memory_space<vmem>>, %arg5: memref<16x32xbf16, #tpu.memory_space<vmem>>, %arg6: memref<1x32xf32, #tpu.memory_space<vmem>>, %arg7: memref<1x3x32x32xbf16, #tpu.memory_space<vmem>>, %arg8: memref<1x3x1x32xf32, #tpu.memory_space<vmem>>, %arg9: memref<1x32x32xbf16, #tpu.memory_space<vmem>>, %arg10: memref<1x1x32xf32, #tpu.memory_space<vmem>>, %arg11: memref<1x1x32xf32, #tpu.memory_space<vmem>>, %arg12: memref<1x1x32xf32, #tpu.memory_space<vmem>>, %arg13: memref<1x32x32xbf16, #tpu.memory_space<vmem>>, %arg14: memref<1x1x32xf32, #tpu.memory_space<vmem>>, %arg15: memref<1x32x32xbf16, #tpu.memory_space<vmem>>, %arg16: memref<1x1x32xf32, #tpu.memory_space<vmem>>, %arg17: memref<1x1x32xf32, #tpu.memory_space<vmem>>, %arg18: memref<1x1x32xf32, #tpu.memory_space<vmem>>, %arg19: memref<1x32xf32, #tpu.memory_space<vmem>>, %arg20: memref<1x32xf32, #tpu.memory_space<vmem>>, %arg21: memref<2x1x32xf32, #tpu.memory_space<vmem>>, %arg22: memref<16x32xf32, #tpu.memory_space<vmem>>) attributes {dimension_semantics = [#tpu.dimension_semantics<parallel>, #tpu.dimension_semantics<arbitrary>], iteration_bounds = array<i64: 1, 2>, scalar_prefetch = 0 : i64, scratch_operands = 1 : i64, tpu.core_type = #tpu.core_type<tc>, window_params = [{transform_indices = @transform_0, window_bounds = array<i64: 2, 8, 16>}, {transform_indices = @transform_1, window_bounds = array<i64: 2, 1, 8>}, {pipeline_mode = #tpu.pipeline_mode<synchronous>, transform_indices = @transform_2, window_bounds = array<i64: 8, 32>}, {pipeline_mode = #tpu.pipeline_mode<synchronous>, transform_indices = @transform_3, window_bounds = array<i64: 16, 32>}, {pipeline_mode = #tpu.pipeline_mode<synchronous>, transform_indices = @transform_4, window_bounds = array<i64: 1, 32>}, {transform_indices = @transform_5, window_bounds = array<i64: 1, 3, 32, 32>}, {transform_indices = @transform_6, window_bounds = array<i64: 1, 3, 1, 32>}, {transform_indices = @transform_7, window_bounds = array<i64: 1, 32, 32>}, {transform_indices = @transform_8, window_bounds = array<i64: 1, 1, 32>}, {transform_indices = @transform_9, window_bounds = array<i64: 1, 1, 32>}, {transform_indices = @transform_10, window_bounds = array<i64: 1, 1, 32>}, {transform_indices = @transform_11, window_bounds = array<i64: 1, 32, 32>}, {transform_indices = @transform_12, window_bounds = array<i64: 1, 1, 32>}, {transform_indices = @transform_13, window_bounds = array<i64: 1, 32, 32>}, {transform_indices = @transform_14, window_bounds = array<i64: 1, 1, 32>}, {transform_indices = @transform_15, window_bounds = array<i64: 1, 1, 32>}, {transform_indices = @transform_16, window_bounds = array<i64: 1, 1, 32>}, {pipeline_mode = #tpu.pipeline_mode<synchronous>, transform_indices = @transform_17, window_bounds = array<i64: 1, 32>}, {pipeline_mode = #tpu.pipeline_mode<synchronous>, transform_indices = @transform_18, window_bounds = array<i64: 1, 32>}, {transform_indices = @transform_19, window_bounds = array<i64: 2, 1, 32>}]} {
    %c0_i32 = arith.constant 0 : i32
    %0 = arith.cmpi eq, %arg1, %c0_i32 : i32
    %1 = arith.extui %0 : i1 to i32
    %c0_i32_0 = arith.constant 0 : i32
    %2 = arith.cmpi ne, %1, %c0_i32_0 : i32
    scf.if %2 {
      %c0_88 = arith.constant 0 : index
      %c0_89 = arith.constant 0 : index
      %c0_90 = arith.constant 0 : index
      %163 = vector.load %arg2[%c0_88, %c0_89, %c0_90] : memref<2x8x16xbf16, #tpu.memory_space<vmem>>, vector<2x8x16xbf16>
      %164 = vector.shape_cast %163 : vector<2x8x16xbf16> to vector<16x16xbf16>
      %c0_91 = arith.constant 0 : index
      %c0_92 = arith.constant 0 : index
      %165 = vector.load %arg5[%c0_91, %c0_92] : memref<16x32xbf16, #tpu.memory_space<vmem>>, vector<16x32xbf16>
      %cst_93 = arith.constant dense<0.000000e+00> : vector<16x32xf32>
      %166 = tpu.matmul %164, %165, %cst_93 {dimension_numbers = #tpu.dot_dimension_numbers<[1], [0], [0], [1], [0, 0, 1, 1], [], []>} : vector<16x16xbf16>, vector<16x32xbf16>, vector<16x32xf32> -> vector<16x32xf32>
      %c0_94 = arith.constant 0 : index
      %c0_95 = arith.constant 0 : index
      %167 = vector.load %arg6[%c0_94, %c0_95] : memref<1x32xf32, #tpu.memory_space<vmem>>, vector<1x32xf32>
      %168 = vector.broadcast %167 : vector<1x32xf32> to vector<16x32xf32>
      %169 = arith.addf %166, %168 : vector<16x32xf32>
      %170 = vector.shape_cast %169 : vector<16x32xf32> to vector<2x8x32xf32>
      %c0_96 = arith.constant 0 : index
      %c0_97 = arith.constant 0 : index
      %171 = vector.load %arg4[%c0_96, %c0_97] : memref<8x32xf32, #tpu.memory_space<vmem>>, vector<8x32xf32>
      %172 = vector.shape_cast %171 : vector<8x32xf32> to vector<1x8x32xf32>
      %173 = vector.broadcast %172 : vector<1x8x32xf32> to vector<2x8x32xf32>
      %174 = arith.addf %170, %173 : vector<2x8x32xf32>
      %175 = vector.shape_cast %174 : vector<2x8x32xf32> to vector<16x32xf32>
      %c0_98 = arith.constant 0 : index
      %c0_99 = arith.constant 0 : index
      %176 = vector.load %arg22[%c0_98, %c0_99] : memref<16x32xf32, #tpu.memory_space<vmem>>, vector<16x32xf32>
      tpu.vector_store %arg22[%c0_98, %c0_99], %175 {strides = array<i32>} : memref<16x32xf32, #tpu.memory_space<vmem>>, vector<16x32xf32>,
    } else {
    }
    %c0 = arith.constant 0 : index
    %c0_1 = arith.constant 0 : index
    %c0_2 = arith.constant 0 : index
    %3 = vector.load %arg3[%c0, %c0_1, %c0_2] : memref<2x1x8xi32, #tpu.memory_space<vmem>>, vector<2x1x8xi32>
    %c0_i32_3 = arith.constant 0 : i32
    %4 = vector.broadcast %c0_i32_3 : i32 to vector<2x1x8xi32>
    %5 = arith.cmpi eq, %3, %4 : vector<2x1x8xi32>
    %c0_4 = arith.constant 0 : index
    %c0_5 = arith.constant 0 : index
    %6 = vector.load %arg22[%c0_4, %c0_5] : memref<16x32xf32, #tpu.memory_space<vmem>>, vector<16x32xf32>
    %7 = arith.truncf %6 : vector<16x32xf32> to vector<16x32xbf16>
    %c0_6 = arith.constant 0 : index
    %c0_7 = arith.constant 0 : index
    %c0_8 = arith.constant 0 : index
    %c0_9 = arith.constant 0 : index
    %8 = vector.load %arg7[%c0_6, %c0_7, %c0_8, %c0_9] : memref<1x3x32x32xbf16, #tpu.memory_space<vmem>>, vector<1x1x32x32xbf16>
    %9 = vector.shape_cast %8 : vector<1x1x32x32xbf16> to vector<32x32xbf16>
    %cst = arith.constant dense<0.000000e+00> : vector<16x32xf32>
    %10 = tpu.matmul %7, %9, %cst {dimension_numbers = #tpu.dot_dimension_numbers<[1], [0], [0], [1], [0, 0, 1, 1], [], []>} : vector<16x32xbf16>, vector<32x32xbf16>, vector<16x32xf32> -> vector<16x32xf32>
    %c0_10 = arith.constant 0 : index
    %c0_11 = arith.constant 0 : index
    %c0_12 = arith.constant 0 : index
    %c0_13 = arith.constant 0 : index
    %11 = vector.load %arg8[%c0_10, %c0_11, %c0_12, %c0_13] : memref<1x3x1x32xf32, #tpu.memory_space<vmem>>, vector<1x1x1x32xf32>
    %12 = vector.shape_cast %11 : vector<1x1x1x32xf32> to vector<1x32xf32>
    %13 = vector.broadcast %12 : vector<1x32xf32> to vector<16x32xf32>
    %14 = arith.addf %10, %13 : vector<16x32xf32>
    %c0_14 = arith.constant 0 : index
    %c1 = arith.constant 1 : index
    %c0_15 = arith.constant 0 : index
    %c0_16 = arith.constant 0 : index
    %15 = vector.load %arg7[%c0_14, %c1, %c0_15, %c0_16] : memref<1x3x32x32xbf16, #tpu.memory_space<vmem>>, vector<1x1x32x32xbf16>
    %16 = vector.shape_cast %15 : vector<1x1x32x32xbf16> to vector<32x32xbf16>
    %cst_17 = arith.constant dense<0.000000e+00> : vector<16x32xf32>
    %17 = tpu.matmul %7, %16, %cst_17 {dimension_numbers = #tpu.dot_dimension_numbers<[1], [0], [0], [1], [0, 0, 1, 1], [], []>} : vector<16x32xbf16>, vector<32x32xbf16>, vector<16x32xf32> -> vector<16x32xf32>
    %c0_18 = arith.constant 0 : index
    %c1_19 = arith.constant 1 : index
    %c0_20 = arith.constant 0 : index
    %c0_21 = arith.constant 0 : index
    %18 = vector.load %arg8[%c0_18, %c1_19, %c0_20, %c0_21] : memref<1x3x1x32xf32, #tpu.memory_space<vmem>>, vector<1x1x1x32xf32>
    %19 = vector.shape_cast %18 : vector<1x1x1x32xf32> to vector<1x32xf32>
    %20 = vector.broadcast %19 : vector<1x32xf32> to vector<16x32xf32>
    %21 = arith.addf %17, %20 : vector<16x32xf32>
    %c0_22 = arith.constant 0 : index
    %c2 = arith.constant 2 : index
    %c0_23 = arith.constant 0 : index
    %c0_24 = arith.constant 0 : index
    %22 = vector.load %arg7[%c0_22, %c2, %c0_23, %c0_24] : memref<1x3x32x32xbf16, #tpu.memory_space<vmem>>, vector<1x1x32x32xbf16>
    %23 = vector.shape_cast %22 : vector<1x1x32x32xbf16> to vector<32x32xbf16>
    %cst_25 = arith.constant dense<0.000000e+00> : vector<16x32xf32>
    %24 = tpu.matmul %7, %23, %cst_25 {dimension_numbers = #tpu.dot_dimension_numbers<[1], [0], [0], [1], [0, 0, 1, 1], [], []>} : vector<16x32xbf16>, vector<32x32xbf16>, vector<16x32xf32> -> vector<16x32xf32>
    %c0_26 = arith.constant 0 : index
    %c2_27 = arith.constant 2 : index
    %c0_28 = arith.constant 0 : index
    %c0_29 = arith.constant 0 : index
    %25 = vector.load %arg8[%c0_26, %c2_27, %c0_28, %c0_29] : memref<1x3x1x32xf32, #tpu.memory_space<vmem>>, vector<1x1x1x32xf32>
    %26 = vector.shape_cast %25 : vector<1x1x1x32xf32> to vector<1x32xf32>
    %27 = vector.broadcast %26 : vector<1x32xf32> to vector<16x32xf32>
    %28 = arith.addf %24, %27 : vector<16x32xf32>
    %cst_30 = arith.constant 2.500000e-01 : f32
    %29 = vector.broadcast %cst_30 : f32 to vector<16x32xf32>
    %30 = arith.mulf %14, %29 : vector<16x32xf32>
    %31 = arith.truncf %30 : vector<16x32xf32> to vector<16x32xbf16>
    %32 = vector.shape_cast %31 : vector<16x32xbf16> to vector<2x8x32xbf16>
    %33 = arith.truncf %21 : vector<16x32xf32> to vector<16x32xbf16>
    %34 = vector.shape_cast %33 : vector<16x32xbf16> to vector<2x8x32xbf16>
    %35 = arith.truncf %28 : vector<16x32xf32> to vector<16x32xbf16>
    %36 = vector.shape_cast %35 : vector<16x32xbf16> to vector<2x8x32xbf16>
    %37 = vector.extract_strided_slice %32 {offsets = [0, 0, 0], sizes = [2, 8, 16], strides = [1, 1, 1]} : vector<2x8x32xbf16> to vector<2x8x16xbf16>
    %38 = vector.extract_strided_slice %34 {offsets = [0, 0, 0], sizes = [2, 8, 16], strides = [1, 1, 1]} : vector<2x8x32xbf16> to vector<2x8x16xbf16>
    "tpu.trace_start"() <{level = 10 : i32, message = "bqd,bkd->bqk"}> : () -> ()
    %cst_31 = arith.constant dense<0.000000e+00> : vector<2x8x8xf32>
    %39 = tpu.matmul %37, %38, %cst_31 {dimension_numbers = #tpu.dot_dimension_numbers<[2], [2], [1], [1], [0, 0, 0, 1, 1, 1], [0], [0]>} : vector<2x8x16xbf16>, vector<2x8x16xbf16>, vector<2x8x8xf32> -> vector<2x8x8xf32>
    %cst_32 = arith.constant -1.000000e+09 : f32
    "tpu.trace_stop"() : () -> ()
    %40 = vector.shape_cast %5 : vector<2x1x8xi1> to vector<2x1x8xi1>
    %41 = vector.broadcast %40 : vector<2x1x8xi1> to vector<2x8x8xi1>
    %42 = vector.broadcast %cst_32 : f32 to vector<2x8x8xf32>
    %43 = arith.select %41, %42, %39 : vector<2x8x8xi1>, vector<2x8x8xf32>
    %cst_33 = arith.constant dense<0xFF800000> : vector<2x8xf32>
    %44 = vector.multi_reduction <maximumf>, %43, %cst_33 [2] : vector<2x8x8xf32> to vector<2x8xf32>
    %45 = vector.shape_cast %44 : vector<2x8xf32> to vector<2x8x1xf32>
    %46 = vector.broadcast %45 : vector<2x8x1xf32> to vector<2x8x8xf32>
    %47 = arith.subf %43, %46 : vector<2x8x8xf32>
    %48 = math.exp %47 : vector<2x8x8xf32>
    %cst_34 = arith.constant dense<0.000000e+00> : vector<2x8xf32>
    %49 = vector.multi_reduction <add>, %48, %cst_34 [2] : vector<2x8x8xf32> to vector<2x8xf32>
    %50 = vector.shape_cast %49 : vector<2x8xf32> to vector<2x8x1xf32>
    %51 = tpu.reciprocal %50 {approx = true} : vector<2x8x1xf32> -> vector<2x8x1xf32>
    %52 = vector.broadcast %51 : vector<2x8x1xf32> to vector<2x8x8xf32>
    %53 = arith.mulf %48, %52 : vector<2x8x8xf32>
    %54 = arith.truncf %53 : vector<2x8x8xf32> to vector<2x8x8xbf16>
    %55 = vector.extract_strided_slice %36 {offsets = [0, 0, 0], sizes = [2, 8, 16], strides = [1, 1, 1]} : vector<2x8x32xbf16> to vector<2x8x16xbf16>
    "tpu.trace_start"() <{level = 10 : i32, message = "bqk,bkd->bqd"}> : () -> ()
    %cst_35 = arith.constant dense<0.000000e+00> : vector<2x8x16xf32>
    %56 = tpu.matmul %54, %55, %cst_35 {dimension_numbers = #tpu.dot_dimension_numbers<[2], [1], [1], [2], [0, 0, 0, 1, 1, 2], [0], [0]>} : vector<2x8x8xbf16>, vector<2x8x16xbf16>, vector<2x8x16xf32> -> vector<2x8x16xf32>
    "tpu.trace_stop"() : () -> ()
    %57 = vector.extract_strided_slice %32 {offsets = [0, 0, 16], sizes = [2, 8, 16], strides = [1, 1, 1]} : vector<2x8x32xbf16> to vector<2x8x16xbf16>
    %58 = vector.extract_strided_slice %34 {offsets = [0, 0, 16], sizes = [2, 8, 16], strides = [1, 1, 1]} : vector<2x8x32xbf16> to vector<2x8x16xbf16>
    "tpu.trace_start"() <{level = 10 : i32, message = "bqd,bkd->bqk"}> : () -> ()
    %cst_36 = arith.constant dense<0.000000e+00> : vector<2x8x8xf32>
    %59 = tpu.matmul %57, %58, %cst_36 {dimension_numbers = #tpu.dot_dimension_numbers<[2], [2], [1], [1], [0, 0, 0, 1, 1, 1], [0], [0]>} : vector<2x8x16xbf16>, vector<2x8x16xbf16>, vector<2x8x8xf32> -> vector<2x8x8xf32>
    %cst_37 = arith.constant -1.000000e+09 : f32
    "tpu.trace_stop"() : () -> ()
    %60 = vector.shape_cast %5 : vector<2x1x8xi1> to vector<2x1x8xi1>
    %61 = vector.broadcast %60 : vector<2x1x8xi1> to vector<2x8x8xi1>
    %62 = vector.broadcast %cst_37 : f32 to vector<2x8x8xf32>
    %63 = arith.select %61, %62, %59 : vector<2x8x8xi1>, vector<2x8x8xf32>
    %cst_38 = arith.constant dense<0xFF800000> : vector<2x8xf32>
    %64 = vector.multi_reduction <maximumf>, %63, %cst_38 [2] : vector<2x8x8xf32> to vector<2x8xf32>
    %65 = vector.shape_cast %64 : vector<2x8xf32> to vector<2x8x1xf32>
    %66 = vector.broadcast %65 : vector<2x8x1xf32> to vector<2x8x8xf32>
    %67 = arith.subf %63, %66 : vector<2x8x8xf32>
    %68 = math.exp %67 : vector<2x8x8xf32>
    %cst_39 = arith.constant dense<0.000000e+00> : vector<2x8xf32>
    %69 = vector.multi_reduction <add>, %68, %cst_39 [2] : vector<2x8x8xf32> to vector<2x8xf32>
    %70 = vector.shape_cast %69 : vector<2x8xf32> to vector<2x8x1xf32>
    %71 = tpu.reciprocal %70 {approx = true} : vector<2x8x1xf32> -> vector<2x8x1xf32>
    %72 = vector.broadcast %71 : vector<2x8x1xf32> to vector<2x8x8xf32>
    %73 = arith.mulf %68, %72 : vector<2x8x8xf32>
    %74 = arith.truncf %73 : vector<2x8x8xf32> to vector<2x8x8xbf16>
    %75 = vector.extract_strided_slice %36 {offsets = [0, 0, 16], sizes = [2, 8, 16], strides = [1, 1, 1]} : vector<2x8x32xbf16> to vector<2x8x16xbf16>
    "tpu.trace_start"() <{level = 10 : i32, message = "bqk,bkd->bqd"}> : () -> ()
    %cst_40 = arith.constant dense<0.000000e+00> : vector<2x8x16xf32>
    %76 = tpu.matmul %74, %75, %cst_40 {dimension_numbers = #tpu.dot_dimension_numbers<[2], [1], [1], [2], [0, 0, 0, 1, 1, 2], [0], [0]>} : vector<2x8x8xbf16>, vector<2x8x16xbf16>, vector<2x8x16xf32> -> vector<2x8x16xf32>
    "tpu.trace_stop"() : () -> ()
    %77 = tpu.concatenate %56, %76 in 2 : vector<2x8x16xf32>, vector<2x8x16xf32> -> vector<2x8x32xf32>
    %78 = vector.shape_cast %77 : vector<2x8x32xf32> to vector<16x32xf32>
    %79 = arith.truncf %78 : vector<16x32xf32> to vector<16x32xbf16>
    %c0_41 = arith.constant 0 : index
    %c0_42 = arith.constant 0 : index
    %c0_43 = arith.constant 0 : index
    %80 = vector.load %arg9[%c0_41, %c0_42, %c0_43] : memref<1x32x32xbf16, #tpu.memory_space<vmem>>, vector<1x32x32xbf16>
    %81 = vector.shape_cast %80 : vector<1x32x32xbf16> to vector<32x32xbf16>
    %cst_44 = arith.constant dense<0.000000e+00> : vector<16x32xf32>
    %82 = tpu.matmul %79, %81, %cst_44 {dimension_numbers = #tpu.dot_dimension_numbers<[1], [0], [0], [1], [0, 0, 1, 1], [], []>} : vector<16x32xbf16>, vector<32x32xbf16>, vector<16x32xf32> -> vector<16x32xf32>
    %c0_45 = arith.constant 0 : index
    %c0_46 = arith.constant 0 : index
    %c0_47 = arith.constant 0 : index
    %83 = vector.load %arg10[%c0_45, %c0_46, %c0_47] : memref<1x1x32xf32, #tpu.memory_space<vmem>>, vector<1x1x32xf32>
    %84 = vector.shape_cast %83 : vector<1x1x32xf32> to vector<1x32xf32>
    %85 = vector.broadcast %84 : vector<1x32xf32> to vector<16x32xf32>
    %86 = arith.addf %82, %85 : vector<16x32xf32>
    %87 = arith.addf %6, %86 : vector<16x32xf32>
    %c0_48 = arith.constant 0 : index
    %c0_49 = arith.constant 0 : index
    %c0_50 = arith.constant 0 : index
    %88 = vector.load %arg11[%c0_48, %c0_49, %c0_50] : memref<1x1x32xf32, #tpu.memory_space<vmem>>, vector<1x1x32xf32>
    %89 = vector.shape_cast %88 : vector<1x1x32xf32> to vector<1x32xf32>
    %c0_51 = arith.constant 0 : index
    %c0_52 = arith.constant 0 : index
    %c0_53 = arith.constant 0 : index
    %90 = vector.load %arg12[%c0_51, %c0_52, %c0_53] : memref<1x1x32xf32, #tpu.memory_space<vmem>>, vector<1x1x32xf32>
    %91 = vector.shape_cast %90 : vector<1x1x32xf32> to vector<1x32xf32>
    %cst_54 = arith.constant dense<0.000000e+00> : vector<16xf32>
    %92 = vector.multi_reduction <add>, %87, %cst_54 [1] : vector<16x32xf32> to vector<16xf32>
    %93 = vector.shape_cast %92 : vector<16xf32> to vector<16x1xf32>
    %cst_55 = arith.constant 3.200000e+01 : f32
    %94 = vector.broadcast %cst_55 : f32 to vector<16x1xf32>
    %95 = arith.divf %93, %94 : vector<16x1xf32>
    %96 = vector.broadcast %95 : vector<16x1xf32> to vector<16x32xf32>
    %97 = arith.subf %87, %96 : vector<16x32xf32>
    %98 = arith.mulf %97, %97 : vector<16x32xf32>
    %cst_56 = arith.constant dense<0.000000e+00> : vector<16xf32>
    %99 = vector.multi_reduction <add>, %98, %cst_56 [1] : vector<16x32xf32> to vector<16xf32>
    %100 = vector.shape_cast %99 : vector<16xf32> to vector<16x1xf32>
    %cst_57 = arith.constant 3.200000e+01 : f32
    %101 = vector.broadcast %cst_57 : f32 to vector<16x1xf32>
    %102 = arith.divf %100, %101 : vector<16x1xf32>
    %103 = vector.broadcast %95 : vector<16x1xf32> to vector<16x32xf32>
    %104 = arith.subf %87, %103 : vector<16x32xf32>
    %cst_58 = arith.constant 9.99999974E-6 : f32
    %105 = vector.broadcast %cst_58 : f32 to vector<16x1xf32>
    %106 = arith.addf %102, %105 : vector<16x1xf32>
    %107 = math.rsqrt %106 : vector<16x1xf32>
    %108 = vector.broadcast %107 : vector<16x1xf32> to vector<16x32xf32>
    %109 = arith.mulf %104, %108 : vector<16x32xf32>
    %110 = vector.broadcast %89 : vector<1x32xf32> to vector<16x32xf32>
    %111 = arith.mulf %109, %110 : vector<16x32xf32>
    %112 = vector.broadcast %91 : vector<1x32xf32> to vector<16x32xf32>
    %113 = arith.addf %111, %112 : vector<16x32xf32>
    %114 = arith.truncf %113 : vector<16x32xf32> to vector<16x32xbf16>
    %c0_59 = arith.constant 0 : index
    %c0_60 = arith.constant 0 : index
    %c0_61 = arith.constant 0 : index
    %115 = vector.load %arg13[%c0_59, %c0_60, %c0_61] : memref<1x32x32xbf16, #tpu.memory_space<vmem>>, vector<1x32x32xbf16>
    %116 = vector.shape_cast %115 : vector<1x32x32xbf16> to vector<32x32xbf16>
    %cst_62 = arith.constant dense<0.000000e+00> : vector<16x32xf32>
    %117 = tpu.matmul %114, %116, %cst_62 {dimension_numbers = #tpu.dot_dimension_numbers<[1], [0], [0], [1], [0, 0, 1, 1], [], []>} : vector<16x32xbf16>, vector<32x32xbf16>, vector<16x32xf32> -> vector<16x32xf32>
    %c0_63 = arith.constant 0 : index
    %c0_64 = arith.constant 0 : index
    %c0_65 = arith.constant 0 : index
    %118 = vector.load %arg14[%c0_63, %c0_64, %c0_65] : memref<1x1x32xf32, #tpu.memory_space<vmem>>, vector<1x1x32xf32>
    %119 = vector.shape_cast %118 : vector<1x1x32xf32> to vector<1x32xf32>
    %120 = vector.broadcast %119 : vector<1x32xf32> to vector<16x32xf32>
    %121 = arith.addf %117, %120 : vector<16x32xf32>
    %cst_66 = arith.constant 0.000000e+00 : f32
    %122 = vector.broadcast %cst_66 : f32 to vector<16x32xf32>
    %123 = arith.maximumf %121, %122 : vector<16x32xf32>
    %124 = arith.truncf %123 : vector<16x32xf32> to vector<16x32xbf16>
    %c0_67 = arith.constant 0 : index
    %c0_68 = arith.constant 0 : index
    %c0_69 = arith.constant 0 : index
    %125 = vector.load %arg15[%c0_67, %c0_68, %c0_69] : memref<1x32x32xbf16, #tpu.memory_space<vmem>>, vector<1x32x32xbf16>
    %126 = vector.shape_cast %125 : vector<1x32x32xbf16> to vector<32x32xbf16>
    %cst_70 = arith.constant dense<0.000000e+00> : vector<16x32xf32>
    %127 = tpu.matmul %124, %126, %cst_70 {dimension_numbers = #tpu.dot_dimension_numbers<[1], [0], [0], [1], [0, 0, 1, 1], [], []>} : vector<16x32xbf16>, vector<32x32xbf16>, vector<16x32xf32> -> vector<16x32xf32>
    %c0_71 = arith.constant 0 : index
    %c0_72 = arith.constant 0 : index
    %c0_73 = arith.constant 0 : index
    %128 = vector.load %arg16[%c0_71, %c0_72, %c0_73] : memref<1x1x32xf32, #tpu.memory_space<vmem>>, vector<1x1x32xf32>
    %129 = vector.shape_cast %128 : vector<1x1x32xf32> to vector<1x32xf32>
    %130 = vector.broadcast %129 : vector<1x32xf32> to vector<16x32xf32>
    %131 = arith.addf %127, %130 : vector<16x32xf32>
    %132 = arith.addf %113, %131 : vector<16x32xf32>
    %c0_74 = arith.constant 0 : index
    %c0_75 = arith.constant 0 : index
    %c0_76 = arith.constant 0 : index
    %133 = vector.load %arg17[%c0_74, %c0_75, %c0_76] : memref<1x1x32xf32, #tpu.memory_space<vmem>>, vector<1x1x32xf32>
    %134 = vector.shape_cast %133 : vector<1x1x32xf32> to vector<1x32xf32>
    %c0_77 = arith.constant 0 : index
    %c0_78 = arith.constant 0 : index
    %c0_79 = arith.constant 0 : index
    %135 = vector.load %arg18[%c0_77, %c0_78, %c0_79] : memref<1x1x32xf32, #tpu.memory_space<vmem>>, vector<1x1x32xf32>
    %136 = vector.shape_cast %135 : vector<1x1x32xf32> to vector<1x32xf32>
    %cst_80 = arith.constant dense<0.000000e+00> : vector<16xf32>
    %137 = vector.multi_reduction <add>, %132, %cst_80 [1] : vector<16x32xf32> to vector<16xf32>
    %138 = vector.shape_cast %137 : vector<16xf32> to vector<16x1xf32>
    %cst_81 = arith.constant 3.200000e+01 : f32
    %139 = vector.broadcast %cst_81 : f32 to vector<16x1xf32>
    %140 = arith.divf %138, %139 : vector<16x1xf32>
    %141 = vector.broadcast %140 : vector<16x1xf32> to vector<16x32xf32>
    %142 = arith.subf %132, %141 : vector<16x32xf32>
    %143 = arith.mulf %142, %142 : vector<16x32xf32>
    %cst_82 = arith.constant dense<0.000000e+00> : vector<16xf32>
    %144 = vector.multi_reduction <add>, %143, %cst_82 [1] : vector<16x32xf32> to vector<16xf32>
    %145 = vector.shape_cast %144 : vector<16xf32> to vector<16x1xf32>
    %cst_83 = arith.constant 3.200000e+01 : f32
    %146 = vector.broadcast %cst_83 : f32 to vector<16x1xf32>
    %147 = arith.divf %145, %146 : vector<16x1xf32>
    %148 = vector.broadcast %140 : vector<16x1xf32> to vector<16x32xf32>
    %149 = arith.subf %132, %148 : vector<16x32xf32>
    %cst_84 = arith.constant 9.99999974E-6 : f32
    %150 = vector.broadcast %cst_84 : f32 to vector<16x1xf32>
    %151 = arith.addf %147, %150 : vector<16x1xf32>
    %152 = math.rsqrt %151 : vector<16x1xf32>
    %153 = vector.broadcast %152 : vector<16x1xf32> to vector<16x32xf32>
    %154 = arith.mulf %149, %153 : vector<16x32xf32>
    %155 = vector.broadcast %134 : vector<1x32xf32> to vector<16x32xf32>
    %156 = arith.mulf %154, %155 : vector<16x32xf32>
    %157 = vector.broadcast %136 : vector<1x32xf32> to vector<16x32xf32>
    %158 = arith.addf %156, %157 : vector<16x32xf32>
    %c0_85 = arith.constant 0 : index
    %c0_86 = arith.constant 0 : index
    %159 = vector.load %arg22[%c0_85, %c0_86] : memref<16x32xf32, #tpu.memory_space<vmem>>, vector<16x32xf32>
    tpu.vector_store %arg22[%c0_85, %c0_86], %158 {strides = array<i32>} : memref<16x32xf32, #tpu.memory_space<vmem>>, vector<16x32xf32>,
    %c1_i32 = arith.constant 1 : i32
    %160 = arith.cmpi eq, %arg1, %c1_i32 : i32
    %161 = arith.extui %160 : i1 to i32
    %c0_i32_87 = arith.constant 0 : i32
    %162 = arith.cmpi ne, %161, %c0_i32_87 : i32
    scf.if %162 {
      %163 = vector.shape_cast %158 : vector<16x32xf32> to vector<2x8x32xf32>
      %164 = vector.extract_strided_slice %163 {offsets = [0, 7, 0], sizes = [2, 1, 32], strides = [1, 1, 1]} : vector<2x8x32xf32> to vector<2x1x32xf32>
      %165 = vector.shape_cast %164 : vector<2x1x32xf32> to vector<2x32xf32>
      %c0_88 = arith.constant 0 : index
      %c0_89 = arith.constant 0 : index
      %166 = vector.load %arg19[%c0_88, %c0_89] : memref<1x32xf32, #tpu.memory_space<vmem>>, vector<1x32xf32>
      %c0_90 = arith.constant 0 : index
      %c0_91 = arith.constant 0 : index
      %167 = vector.load %arg20[%c0_90, %c0_91] : memref<1x32xf32, #tpu.memory_space<vmem>>, vector<1x32xf32>
      %cst_92 = arith.constant dense<0.000000e+00> : vector<2xf32>
      %168 = vector.multi_reduction <add>, %165, %cst_92 [1] : vector<2x32xf32> to vector<2xf32>
      %169 = vector.shape_cast %168 : vector<2xf32> to vector<2x1xf32>
      %cst_93 = arith.constant 3.200000e+01 : f32
      %170 = vector.broadcast %cst_93 : f32 to vector<2x1xf32>
      %171 = arith.divf %169, %170 : vector<2x1xf32>
      %172 = vector.broadcast %171 : vector<2x1xf32> to vector<2x32xf32>
      %173 = arith.subf %165, %172 : vector<2x32xf32>
      %174 = arith.mulf %173, %173 : vector<2x32xf32>
      %cst_94 = arith.constant dense<0.000000e+00> : vector<2xf32>
      %175 = vector.multi_reduction <add>, %174, %cst_94 [1] : vector<2x32xf32> to vector<2xf32>
      %176 = vector.shape_cast %175 : vector<2xf32> to vector<2x1xf32>
      %cst_95 = arith.constant 3.200000e+01 : f32
      %177 = vector.broadcast %cst_95 : f32 to vector<2x1xf32>
      %178 = arith.divf %176, %177 : vector<2x1xf32>
      %179 = vector.broadcast %171 : vector<2x1xf32> to vector<2x32xf32>
      %180 = arith.subf %165, %179 : vector<2x32xf32>
      %cst_96 = arith.constant 9.99999997E-7 : f32
      %181 = vector.broadcast %cst_96 : f32 to vector<2x1xf32>
      %182 = arith.addf %178, %181 : vector<2x1xf32>
      %183 = math.rsqrt %182 : vector<2x1xf32>
      %184 = vector.broadcast %183 : vector<2x1xf32> to vector<2x32xf32>
      %185 = arith.mulf %180, %184 : vector<2x32xf32>
      %186 = vector.broadcast %166 : vector<1x32xf32> to vector<2x32xf32>
      %187 = arith.mulf %185, %186 : vector<2x32xf32>
      %188 = vector.broadcast %167 : vector<1x32xf32> to vector<2x32xf32>
      %189 = arith.addf %187, %188 : vector<2x32xf32>
      %190 = vector.shape_cast %189 : vector<2x32xf32> to vector<2x1x32xf32>
      %c0_97 = arith.constant 0 : index
      %c0_98 = arith.constant 0 : index
      %c0_99 = arith.constant 0 : index
      %191 = vector.load %arg21[%c0_97, %c0_98, %c0_99] : memref<2x1x32xf32, #tpu.memory_space<vmem>>, vector<2x1x32xf32>
      tpu.vector_store %arg21[%c0_97, %c0_98, %c0_99], %190 {strides = array<i32>} : memref<2x1x32xf32, #tpu.memory_space<vmem>>, vector<2x1x32xf32>,
    } else {
    }
    return
  }
  func.func @transform_0(%arg0: i32, %arg1: i32) -> (i32, i32, i32) {
    %c0_i32 = arith.constant 0 : i32
    %c0_i32_0 = arith.constant 0 : i32
    %c0_i32_1 = arith.constant 0 : i32
    return %arg0, %c0_i32, %c0_i32_0 : i32, i32, i32
  }
  func.func @transform_1(%arg0: i32, %arg1: i32) -> (i32, i32, i32) {
    %c0_i32 = arith.constant 0 : i32
    %c0_i32_0 = arith.constant 0 : i32
    %c0_i32_1 = arith.constant 0 : i32
    return %arg0, %c0_i32, %c0_i32_0 : i32, i32, i32
  }
  func.func @transform_2(%arg0: i32, %arg1: i32) -> (i32, i32) {
    %c0_i32 = arith.constant 0 : i32
    %c0_i32_0 = arith.constant 0 : i32
    %c0_i32_1 = arith.constant 0 : i32
    return %c0_i32, %c0_i32_0 : i32, i32
  }
  func.func @transform_3(%arg0: i32, %arg1: i32) -> (i32, i32) {
    %c0_i32 = arith.constant 0 : i32
    %c0_i32_0 = arith.constant 0 : i32
    %c0_i32_1 = arith.constant 0 : i32
    return %c0_i32, %c0_i32_0 : i32, i32
  }
  func.func @transform_4(%arg0: i32, %arg1: i32) -> (i32, i32) {
    %c0_i32 = arith.constant 0 : i32
    %c0_i32_0 = arith.constant 0 : i32
    %c0_i32_1 = arith.constant 0 : i32
    return %c0_i32, %c0_i32_0 : i32, i32
  }
  func.func @transform_5(%arg0: i32, %arg1: i32) -> (i32, i32, i32, i32) {
    %c0_i32 = arith.constant 0 : i32
    %c0_i32_0 = arith.constant 0 : i32
    %c0_i32_1 = arith.constant 0 : i32
    %c0_i32_2 = arith.constant 0 : i32
    return %arg1, %c0_i32, %c0_i32_0, %c0_i32_1 : i32, i32, i32, i32
  }
  func.func @transform_6(%arg0: i32, %arg1: i32) -> (i32, i32, i32, i32) {
    %c0_i32 = arith.constant 0 : i32
    %c0_i32_0 = arith.constant 0 : i32
    %c0_i32_1 = arith.constant 0 : i32
    %c0_i32_2 = arith.constant 0 : i32
    return %arg1, %c0_i32, %c0_i32_0, %c0_i32_1 : i32, i32, i32, i32
  }
  func.func @transform_7(%arg0: i32, %arg1: i32) -> (i32, i32, i32) {
    %c0_i32 = arith.constant 0 : i32
    %c0_i32_0 = arith.constant 0 : i32
    %c0_i32_1 = arith.constant 0 : i32
    return %arg1, %c0_i32, %c0_i32_0 : i32, i32, i32
  }
  func.func @transform_8(%arg0: i32, %arg1: i32) -> (i32, i32, i32) {
    %c0_i32 = arith.constant 0 : i32
    %c0_i32_0 = arith.constant 0 : i32
    %c0_i32_1 = arith.constant 0 : i32
    return %arg1, %c0_i32, %c0_i32_0 : i32, i32, i32
  }
  func.func @transform_9(%arg0: i32, %arg1: i32) -> (i32, i32, i32) {
    %c0_i32 = arith.constant 0 : i32
    %c0_i32_0 = arith.constant 0 : i32
    %c0_i32_1 = arith.constant 0 : i32
    return %arg1, %c0_i32, %c0_i32_0 : i32, i32, i32
  }
  func.func @transform_10(%arg0: i32, %arg1: i32) -> (i32, i32, i32) {
    %c0_i32 = arith.constant 0 : i32
    %c0_i32_0 = arith.constant 0 : i32
    %c0_i32_1 = arith.constant 0 : i32
    return %arg1, %c0_i32, %c0_i32_0 : i32, i32, i32
  }
  func.func @transform_11(%arg0: i32, %arg1: i32) -> (i32, i32, i32) {
    %c0_i32 = arith.constant 0 : i32
    %c0_i32_0 = arith.constant 0 : i32
    %c0_i32_1 = arith.constant 0 : i32
    return %arg1, %c0_i32, %c0_i32_0 : i32, i32, i32
  }
  func.func @transform_12(%arg0: i32, %arg1: i32) -> (i32, i32, i32) {
    %c0_i32 = arith.constant 0 : i32
    %c0_i32_0 = arith.constant 0 : i32
    %c0_i32_1 = arith.constant 0 : i32
    return %arg1, %c0_i32, %c0_i32_0 : i32, i32, i32
  }
  func.func @transform_13(%arg0: i32, %arg1: i32) -> (i32, i32, i32) {
    %c0_i32 = arith.constant 0 : i32
    %c0_i32_0 = arith.constant 0 : i32
    %c0_i32_1 = arith.constant 0 : i32
    return %arg1, %c0_i32, %c0_i32_0 : i32, i32, i32
  }
  func.func @transform_14(%arg0: i32, %arg1: i32) -> (i32, i32, i32) {
    %c0_i32 = arith.constant 0 : i32
    %c0_i32_0 = arith.constant 0 : i32
    %c0_i32_1 = arith.constant 0 : i32
    return %arg1, %c0_i32, %c0_i32_0 : i32, i32, i32
  }
  func.func @transform_15(%arg0: i32, %arg1: i32) -> (i32, i32, i32) {
    %c0_i32 = arith.constant 0 : i32
    %c0_i32_0 = arith.constant 0 : i32
    %c0_i32_1 = arith.constant 0 : i32
    return %arg1, %c0_i32, %c0_i32_0 : i32, i32, i32
  }
  func.func @transform_16(%arg0: i32, %arg1: i32) -> (i32, i32, i32) {
    %c0_i32 = arith.constant 0 : i32
    %c0_i32_0 = arith.constant 0 : i32
    %c0_i32_1 = arith.constant 0 : i32
    return %arg1, %c0_i32, %c0_i32_0 : i32, i32, i32
  }
  func.func @transform_17(%arg0: i32, %arg1: i32) -> (i32, i32) {
    %c0_i32 = arith.constant 0 : i32
    %c0_i32_0 = arith.constant 0 : i32
    %c0_i32_1 = arith.constant 0 : i32
    return %c0_i32, %c0_i32_0 : i32, i32
  }
  func.func @transform_18(%arg0: i32, %arg1: i32) -> (i32, i32) {
    %c0_i32 = arith.constant 0 : i32
    %c0_i32_0 = arith.constant 0 : i32
    %c0_i32_1 = arith.constant 0 : i32
    return %c0_i32, %c0_i32_0 : i32, i32
  }
  func.func @transform_19(%arg0: i32, %arg1: i32) -> (i32, i32, i32) {
    %c0_i32 = arith.constant 0 : i32
    %c0_i32_0 = arith.constant 0 : i32
    %c0_i32_1 = arith.constant 0 : i32
    return %arg0, %c0_i32, %c0_i32_0 : i32, i32, i32
  }
}

</mosaic_0001>

<bundles_post_ra>
// kernel: sasrec_forward.3
= control target key start
LH: loop header
LB: loop body
LE: loop exit
PB: predicated region body
PF: predicated region fallthrough
CT: control target
= control target key end

     0   :  { %9 = vsyncpa [#allocation3], 0  ;;  %s551_s0 = inlined_call_operand.hbm [shape: bf16[2,32], index: 0, kind: input, shape index: {}]   ;;  %s552_s1 = inlined_call_operand.hbm [shape: bf16[64,16], index: 1, kind: input, shape index: {}]   ;;  %s553_s2 = inlined_call_operand.hbm [shape: bf16[16,32], index: 2, kind: input, shape index: {}]   ;;  %s554_s3 = inlined_call_operand.hbm [shape: f32[1,32], index: 3, kind: input, shape index: {}]   ;;  %s555_s4 = inlined_call_operand.hbm [shape: f32[2,64], index: 4, kind: output, shape index: {}]  }
   0x1   :  { %10 = vsyncpa [#allocation6], 0 }
   0x2   :  { %11 = vsyncpa [#allocation9], 0 }
   0x3   :  { %12 = vsyncpa [#allocation4], 0  ;;  %s446_s15 = smov [#allocation5]   ;;  %s328_s19 = scalar_lea.hbm %s552_s1, 512 }
   0x4   :  { %s28_s16 = sshll.u32 %s446_s15, 4  ;;  %p329_p0 = scmp.ne.s32.totalorder %s552_s1, %s328_s19  ;;  %s29_s16 = int_to_ptr.vmem [resolvable:$true] %s28_s16 }
   0x5   :  { %p332_p1 = scmp.lt.u32.totalorder %s328_s19, %s552_s1 }
   0x7   :  { %p334_p2 = pnand %p332_p1, %p329_p0 }
   0x9   :  { %337 = shalt.err (!%p334_p2)
}
   0xa   :  { %s338_s24 = scalar_lea.vmem %s29_s16, 512  ;;  %p343_p4 = scmp.lt.s32.totalorder %s29_s16, %s29_s16 }
   0xb   :  { %p339_p3 = scmp.ne.s32.totalorder %s29_s16, %s338_s24  ;;  %p344_p5 = scmp.lt.s32.totalorder %s338_s24, %s338_s24 }
   0xd   :  { %p345_p6 = por %p344_p5, %p343_p4 }
   0xf   :  { %p346_p7 = pnand %p345_p6, %p339_p3 }
  0x11   :  { %349 = shalt.err (!%p346_p7)
}
  0x12   :  { %s447_s25 = smov 64   ;;  %s448_s26 = smov 4  }
  0x13   :  { %34 = dma.hbm_to_vmem [thread:$0]  %s552_s1, 512, %s29_s16, [#allocation6], %s447_s25, %s447_s25, %s448_s26  }
  0x14   :  { %s449_s29 = smov [#allocation2]   ;;  %s450_s5 = smov [#allocation7]  }
  0x15   :  { %s19_s30 = sshll.u32 %s449_s29, 4  ;;  %s40_s6 = sshll.u32 %s450_s5, 4  ;;  %s20_s30 = int_to_ptr.vmem [resolvable:$true] %s19_s30  ;;  %s41_s6 = int_to_ptr.vmem [resolvable:$true] %s40_s6 }
  0x16   :  { %s350_s9 = scalar_lea.hbm %s551_s0, 16 }
  0x17   :  { %p351_p8 = scmp.ne.s32.totalorder %s551_s0, %s350_s9  ;;  %p354_p9 = scmp.lt.u32.totalorder %s350_s9, %s551_s0 }
  0x19   :  { %p356_p10 = pnand %p354_p9, %p351_p8 }
  0x1b   :  { %359 = shalt.err (!%p356_p10)
}
  0x1c   :  { %s360_s1 = scalar_lea.vmem %s20_s30, 16  ;;  %s364_s14 = scalar_lea.vmem %s20_s30, 32 }
  0x1d   :  { %p361_p11 = scmp.ne.s32.totalorder %s20_s30, %s360_s1  ;;  %p365_p12 = scmp.lt.s32.totalorder %s20_s30, %s20_s30 }
  0x1e   :  { %p366_p13 = scmp.lt.s32.totalorder %s364_s14, %s360_s1 }
  0x20   :  { %p367_p0 = por %p366_p13, %p365_p12 }
  0x22   :  { %p368_p1 = pnand %p367_p0, %p361_p11 }
  0x24   :  { %371 = shalt.err (!%p368_p1)
}
  0x25   :  { %22 = dma.hbm_to_vmem [thread:$0]  %s551_s0, 16, %s20_s30, [#allocation3]  }
  0x26   :  { %s372_s19 = scalar_lea.hbm %s553_s2, 128 }
  0x27   :  { %p373_p2 = scmp.ne.s32.totalorder %s553_s2, %s372_s19  ;;  %p376_p3 = scmp.lt.u32.totalorder %s372_s19, %s553_s2 }
  0x29   :  { %p378_p4 = pnand %p376_p3, %p373_p2 }
  0x2b   :  { %381 = shalt.err (!%p378_p4)
}
  0x2c   :  { %s382_s24 = scalar_lea.vmem %s41_s6, 128  ;;  %p387_p6 = scmp.lt.s32.totalorder %s41_s6, %s41_s6 }
  0x2d   :  { %p383_p5 = scmp.ne.s32.totalorder %s41_s6, %s382_s24  ;;  %p388_p7 = scmp.lt.s32.totalorder %s382_s24, %s382_s24 }
  0x2f   :  { %p389_p8 = por %p388_p7, %p387_p6 }
  0x31   :  { %p390_p9 = pnand %p389_p8, %p383_p5 }
  0x33   :  { %393 = shalt.err (!%p390_p9)
}
  0x34   :  { %46 = dma.hbm_to_vmem [thread:$0]  %s553_s2, 128, %s41_s6, [#allocation6], %s447_s25, %s447_s25, %s448_s26  }
  0x35   :  { %s451_s28 = smov [#allocation8]   ;;  %s394_s7 = scalar_lea.hbm %s554_s3, 16 }
  0x36   :  { %s53_s29 = sshll.u32 %s451_s28, 4  ;;  %p395_p10 = scmp.ne.s32.totalorder %s554_s3, %s394_s7  ;;  %s54_s29 = int_to_ptr.vmem [resolvable:$true] %s53_s29 }
  0x37   :  { %p398_p11 = scmp.lt.u32.totalorder %s394_s7, %s554_s3 }
  0x39   :  { %p400_p12 = pnand %p398_p11, %p395_p10 }
  0x3b   :  { %403 = shalt.err (!%p400_p12)
}
  0x3c   :  { %s404_s12 = scalar_lea.vmem %s54_s29, 16  ;;  %s408_s2 = scalar_lea.vmem %s54_s29, 32 }
  0x3d   :  { %p405_p13 = scmp.ne.s32.totalorder %s54_s29, %s404_s12  ;;  %p409_p0 = scmp.lt.s32.totalorder %s54_s29, %s54_s29 }
  0x3e   :  { %p410_p1 = scmp.lt.s32.totalorder %s408_s2, %s404_s12 }
  0x40   :  { %p411_p2 = por %p410_p1, %p409_p0 }
  0x42   :  { %p412_p3 = pnand %p411_p2, %p405_p13 }
  0x44   :  { %415 = shalt.err (!%p412_p3)
}
  0x45   :  { %56 = dma.hbm_to_vmem [thread:$0]  %s554_s3, 16, %s54_s29, [#allocation9]  }
  0x46   :  { %438 = dma.done.wait [#allocation3], 16  }
  0x47   :  { %439 = vsyncadd [#allocation3], 4294967280 }
  0x48   :  { %440 = dma.done.wait [#allocation6], 640  }
  0x49   :  { %441 = vsyncadd [#allocation6], 4294966656 }
  0x4a   :  { %442 = dma.done.wait [#allocation9], 16  }
  0x4b   :  { %443 = vsyncadd [#allocation9], 4294967280  ;;  %v323_v0 = vld [vmem:[#allocation7] sm:$0xff]   ;;  %vm113_vm0 = vcmask 130048   ;;  %v325_v2 = vld [vmem:[#allocation5 + $0x8] sm:$0xff]   ;;  %v452_v5 = vmov 0.0  }
  0x4c   :  { %v324_v1 = vld [vmem:[#allocation5] sm:$0xff]   ;;  %292 = vmatprep.subr.bf16.mxu0 %v323_v0  ;;  %v326_v3 = vld [vmem:[#allocation5 + $0x10] sm:$0xff]   ;;  %v327_v4 = vld [vmem:[#allocation5 + $0x18] sm:$0xff]   ;;  %302 = vmatprep.subr.bf16.mxu1 %v452_v5  ;;  %vm453_vm1 = vmmov 0   ;;  %vm196_vm2 = vcmask 261120   ;;  %s454_s3 = smov [#allocation10]  }
  0x4d   :  { %293 = vmatpush3.bf16.msra.mxu0 %v323_v0  ;;  %294 = vmatprep.mubr.msk.bf16.mxu0 %vm113_vm0, %v324_v1  ;;  %v271_v7 = vld [vmem:[#allocation8] ss:$0 sm:$0xff]  ;;  %v191_v31 = vld [vmem:[#allocation2] sm:$0x1]  ;;  %s260_s6 = sshll.u32 %s454_s3, 4  ;;  %vm252_vm3 = vcmask 517120   ;;  %s261_s6 = int_to_ptr.vmem [resolvable:$true] %s260_s6 }
  0x4e   :  { %310 = vmatprep.mubr.msk.bf16.mxu1 %vm453_vm1, %v452_v5  ;;  %s416_s13 = scalar_lea.vmem %s261_s6, 32  ;;  %p421_p5 = scmp.lt.s32.totalorder %s261_s6, %s261_s6 }
  0x4f   :  { %p417_p4 = scmp.ne.s32.totalorder %s261_s6, %s416_s13  ;;  %p422_p6 = scmp.lt.s32.totalorder %s416_s13, %s416_s13 }
  0x50   :  { %295 = vmatmul.mubr.msk.bf16.vlgmr.msra.gmra.mrb[0].mxu0 %vm113_vm0, %v325_v2 }
  0x51   :  { %298 = vmatprep.mubr.msk.bf16.mxu0 %vm113_vm0, %v326_v3  ;;  %p423_p7 = por %p422_p6, %p421_p5 }
  0x53   :  { %p424_p8 = pnand %p423_p7, %p417_p4 }
  0x58   :  { %299 = vmatmul.mubr.msk.bf16.gmra.mrb[4].mxu0 %vm113_vm0, %v327_v4 }
 0x123   :  { %v296_v6 = vpop.f32.mrb[0].mxu0 }
 0x124   :  { %v160_v8 = vpop.f32.mrb[1].mxu0  ;;  %v169_v10 = vadd.f32 %v296_v6, %v271_v7 }
 0x125   :  { %v297_v9 = vpop.f32.mrb[2].mxu0  ;;  %v161_v13 = vadd.f32 %v271_v7, %v160_v8 }
 0x126   :  { %v172_v11 = vadd.f32 %v297_v9, %v271_v7  ;;  %v163_v12 = vpop.f32.mrb[3].mxu0 }
 0x127   :  { %v164_v14 = vadd.f32 %v271_v7, %v163_v12 }
 0x128   :  { %v193_v15 = vpack.c.bf16 %v172_v11, %v169_v10 }
 0x129   :  { %v192_v16 = vpack.c.bf16 %v164_v14, %v161_v13 }
 0x12a   :  { %v204_v28 = vsel %vm196_vm2, %v193_v15, 0 }
 0x12b   :  { %v201_v17 = vsel %vm196_vm2, %v192_v16, 0  ;;  %v300_v18 = vpop.f32.mrb[4].mxu0 }
 0x12c   :  { %303 = vmatpush3.bf16.xpose.msra.mxu1 %v201_v17  ;;  %v185_v19 = vadd.f32 %v300_v18, %v271_v7  ;;  %v176_v20 = vpop.f32.mrb[5].mxu0 }
 0x12d   :  { %v177_v21 = vadd.f32 %v271_v7, %v176_v20  ;;  %v301_v22 = vpop.f32.mrb[6].mxu0  ;;  %304 = vmatprep.subr.bf16.mxu1 %v452_v5 }
 0x12e   :  { %v188_v23 = vadd.f32 %v301_v22, %v271_v7  ;;  %v179_v24 = vpop.f32.mrb[7].mxu0 }
 0x12f   :  { %v180_v25 = vadd.f32 %v271_v7, %v179_v24 }
 0x130   :  { %v195_v26 = vpack.c.bf16 %v188_v23, %v185_v19 }
 0x131   :  { %v194_v27 = vpack.c.bf16 %v180_v25, %v177_v21 }
 0x132   :  { %v210_v30 = vsel %vm196_vm2, %v195_v26, 0 }
 0x133   :  { %v207_v29 = vsel %vm196_vm2, %v194_v27, 0 }
 0x134   :  { %305 = vmatpush3.bf16.xpose.msra.mxu1 %v204_v28 }
 0x135   :  { %306 = vmatprep.subr.bf16.mxu1 %v452_v5 }
 0x13c   :  { %307 = vmatpush3.bf16.xpose.msra.mxu1 %v207_v29 }
 0x13d   :  { %308 = vmatprep.subr.bf16.mxu1 %v452_v5 }
 0x144   :  { %309 = vmatpush3.bf16.xpose.msra.mxu1 %v210_v30 }
 0x14b   :  { %311 = vmatmul.mubr.msk.bf16.vlgmr.msra.gmra.mrb[0].mxu1 %vm196_vm2, %v191_v31 }
 0x21e   :  { %v246_v32 = vpop.f32.mrb[0].mxu1 }
 0x21f   :  { %v312_v33 = vpop.f32.mrb[1].mxu1  ;;  %253 = vst.msk [vmem:[#allocation10] sm:$0x3] %vm252_vm3, %v246_v32 }
 0x220   :  { %v249_v34 = vpop.f32.mrb[2].mxu1 }
 0x221   :  { %427 = shalt.err (!%p424_p8)
}
 0x222   :  { %s428_s15 = scalar_lea.hbm %s555_s4, 32 }
 0x223   :  { %p429_p9 = scmp.ne.s32.totalorder %s555_s4, %s428_s15  ;;  %p432_p10 = scmp.lt.u32.totalorder %s428_s15, %s555_s4 }
 0x225   :  { %p434_p11 = pnand %p432_p10, %p429_p9 }
 0x227   :  { %437 = shalt.err (!%p434_p11)
}
 0x228   :  { %263 = dma.vmem_to_hbm [thread:$0]  %s261_s6, 32, %s555_s4, [#allocation4]   ;;  %v313_v35 = vpop.f32.mrb[3].mxu1 }
 0x229   :  { %444 = dma.done.wait [#allocation4], 32  }
 0x22a   :  { %445 = vsyncadd [#allocation4], 4294967264 }
 0x22b   :  { %267 = vsyncpa [#allocation3], 1 }
 0x22c   :  { %268 = vsyncpa [#allocation6], 1 }
 0x22d   :  { %269 = vsyncpa [#allocation9], 1 }
 0x22e   :  { %270 = vsyncpa [#allocation4], 1 }

// kernel: sasrec_forward.2
= control target key start
LH: loop header
LB: loop body
LE: loop exit
PB: predicated region body
PF: predicated region fallthrough
CT: control target
= control target key end

     0   :  { %s4818_s0 = inlined_call_operand.hbm [shape: bf16[2,8,16], index: 0, kind: input, shape index: {}]   ;;  %s4819_s1 = inlined_call_operand.hbm [shape: s32[2,1,8], index: 1, kind: input, shape index: {}]   ;;  %s4820_s2 = inlined_call_operand.hbm [shape: f32[8,32], index: 2, kind: input, shape index: {}]   ;;  %s4821_s3 = inlined_call_operand.hbm [shape: bf16[16,32], index: 3, kind: input, shape index: {}]   ;;  %s4822_s4 = inlined_call_operand.hbm [shape: f32[1,32], index: 4, kind: input, shape index: {}]   ;;  %s4823_s5 = inlined_call_operand.hbm [shape: bf16[2,3,32,32], index: 5, kind: input, shape index: {}]   ;;  %s4824_s6 = inlined_call_operand.hbm [shape: f32[2,3,1,32], index: 6, kind: input, shape index: {}]   ;;  %s4825_s7 = inlined_call_operand.hbm [shape: bf16[2,32,32], index: 7, kind: input, shape index: {}]   ;;  %s4826_s8 = inlined_call_operand.hbm [shape: f32[2,1,32], index: 8, kind: input, shape index: {}]   ;;  %s4827_s9 = inlined_call_operand.hbm [shape: f32[2,1,32], index: 9, kind: input, shape index: {}]   ;;  %s4828_s10 = inlined_call_operand.hbm [shape: f32[2,1,32], index: 10, kind: input, shape index: {}]   ;;  %s4829_s11 = inlined_call_operand.hbm [shape: bf16[2,32,32], index: 11, kind: input, shape index: {}]   ;;  %s4830_s12 = inlined_call_operand.hbm [shape: f32[2,1,32], index: 12, kind: input, shape index: {}]   ;;  %s4831_s13 = inlined_call_operand.hbm [shape: bf16[2,32,32], index: 13, kind: input, shape index: {}]   ;;  %s4832_s14 = inlined_call_operand.hbm [shape: f32[2,1,32], index: 14, kind: input, shape index: {}]   ;;  %s4833_s15 = inlined_call_operand.hbm [shape: f32[2,1,32], index: 15, kind: input, shape index: {}]   ;;  %s4834_s16 = inlined_call_operand.hbm [shape: f32[2,1,32], index: 16, kind: input, shape index: {}]   ;;  %s4835_s17 = inlined_call_operand.hbm [shape: f32[1,32], index: 17, kind: input, shape index: {}]   ;;  %s4836_s18 = inlined_call_operand.hbm [shape: f32[1,32], index: 18, kind: input, shape index: {}]   ;;  %s4837_s19 = inlined_call_operand.hbm [shape: f32[2,1,32], index: 19, kind: output, shape index: {}]  }
   0x1   :  { %4881 = sst [smem:[#allocation51_spill]] %s4818_s0 }
   0x2   :  { %4882 = sst [smem:[#allocation52_spill]] %s4819_s1 }
   0x3   :  { %4883 = sst [smem:[#allocation53_spill]] %s4820_s2 }
   0x4   :  { %4884 = sst [smem:[#allocation54_spill]] %s4821_s3 }
   0x5   :  { %4885 = sst [smem:[#allocation55_spill]] %s4823_s5 }
   0x6   :  { %4886 = sst [smem:[#allocation56_spill]] %s4824_s6 }
   0x7   :  { %4887 = sst [smem:[#allocation57_spill]] %s4825_s7 }
   0x8   :  { %4888 = sst [smem:[#allocation58_spill]] %s4826_s8 }
   0x9   :  { %4889 = sst [smem:[#allocation59_spill]] %s4827_s9 }
   0xa   :  { %4890 = sst [smem:[#allocation60_spill]] %s4828_s10 }
   0xb   :  { %4891 = sst [smem:[#allocation61_spill]] %s4829_s11 }
   0xc   :  { %4892 = sst [smem:[#allocation62_spill]] %s4830_s12 }
   0xd   :  { %4893 = sst [smem:[#allocation63_spill]] %s4831_s13 }
   0xe   :  { %4894 = sst [smem:[#allocation64_spill]] %s4832_s14 }
   0xf   :  { %4895 = sst [smem:[#allocation65_spill]] %s4834_s16 }
  0x10   :  { %4896 = sst [smem:[#allocation66_spill]] %s4835_s17 }
  0x11   :  { %4897 = sst [smem:[#allocation67_spill]] %s4836_s18 }
  0x12   :  { %4898 = sst [smem:[#allocation68_spill]] %s4837_s19 }
  0x13   :  { %24 = vsyncpa [#allocation4], 0 }
  0x14   :  { %25 = vsyncpa [#allocation7], 0 }
  0x15   :  { %26 = vsyncpa [#allocation10], 0 }
  0x16   :  { %27 = vsyncpa [#allocation13], 0 }
  0x17   :  { %29 = vsyncpa [#allocation13 + $0x1], 0 }
  0x18   :  { %30 = vsyncpa [#allocation16], 0 }
  0x19   :  { %32 = vsyncpa [#allocation16 + $0x1], 0 }
  0x1a   :  { %33 = vsyncpa [#allocation19], 0 }
  0x1b   :  { %35 = vsyncpa [#allocation19 + $0x1], 0 }
  0x1c   :  { %36 = vsyncpa [#allocation22], 0 }
  0x1d   :  { %38 = vsyncpa [#allocation22 + $0x1], 0 }
  0x1e   :  { %39 = vsyncpa [#allocation25], 0 }
  0x1f   :  { %41 = vsyncpa [#allocation25 + $0x1], 0 }
  0x20   :  { %42 = vsyncpa [#allocation28], 0 }
  0x21   :  { %44 = vsyncpa [#allocation28 + $0x1], 0 }
  0x22   :  { %45 = vsyncpa [#allocation31], 0 }
  0x23   :  { %46 = vsyncpa [#allocation5], 0  ;;  %s3923_s0 = smov 0   ;;  %s3925_s30 = smov 0  }
  0x24   :  { %s3927_s20 = smov 0   ;;  %s3929_s21 = smov 0  }
  0x25   :  { %s3931_s1 = smov 0   ;;  %s3933_s22 = smov 0  }
  0x26 LB: > { %4899 = sst [smem:[#allocation45_spill]] %s3781_s21  ;;  %s3952_s2 = sadd.s32 4294967295, %s3789_s22   ;;  %s3789_s22 = sphi %s3933_s22, %s52_s22   ;;  %s3785_s1 = sphi %s3931_s1, %s4979_s1   ;;  %s3781_s21 = sphi %s3929_s21, %s4978_s21   ;;  %s3777_s20 = sphi %s3927_s20, %s4977_s20   ;;  %s3773_s30 = sphi %s3925_s30, %s4976_s30   ;;  %s3769_s0 = sphi %s3923_s0, %s4975_s0  }
  0x27   : > { %4900 = sst [smem:[#allocation46_spill]] %s3952_s2  ;;  %p199_p0 = scmp.ne.s32.totalorder %s3773_s30, %s3769_s0 }
  0x28   : > { %p4850_p1 = scmp.eq.s32.totalorder %s3952_s2, 0  ;;  %p2615_p2 = scmp.ge.s32.totalorder %s3789_s22, 1 }
  0x29   : > { %p564_p3 = scmp.lt.s32.totalorder %s3789_s22, 3  ;;  %s3791_s25 = smov [#allocation6]  }
  0x2a   : > { %p3960_p4 = por %p4850_p1, %p199_p0  ;;  %s595_s3 = sshll.u32 %s3791_s25, 4  ;;  %s596_s3 = int_to_ptr.vmem [resolvable:$true] %s595_s3 }
  0x2b   : > { %p3964_p5 = pnand %p2615_p2, %p564_p3  ;;  %s3792_s27 = smov [#allocation9]  }
  0x2c   : > { %s4901_s23 = scalar_select %p3960_p4, 1, 0 }
  0x2d   : > { %s4903_s24 = scalar_select %p3964_p5, 1, 0 }
  0x2e   : > { %4902 = sst [smem:[#allocation47_spill]] %s4901_s23  ;;  %p2926_p6 = pneg %p3964_p5 }
  0x2f   : > { %4904 = sst [smem:[#allocation48_spill]] %s4903_s24  ;;  %s619_s28 = sshll.u32 %s3792_s27, 4  ;;  %s620_s28 = int_to_ptr.vmem [resolvable:$true] %s619_s28 }
  0x30   : > { %p3972_p7 = pnand %p2926_p6, %p4850_p1  ;;  %s4906_s19 = sld [smem:[#allocation52_spill]] }
  0x32   : > { %s4905_s26 = scalar_select %p3972_p7, 1, 0 }
  0x33   : > { %p3984_p9 = pneg %p3972_p7 }
  0x35   : > { %s4907_s25 = scalar_select %p3984_p9, 1, 0 }
  0x36   : > { %s3117_s21 = scalar_lea.hbm %s4906_s19, 32 }
  0x37   : > { %p3118_p8 = scmp.ne.s32.totalorder %s4906_s19, %s3117_s21  ;;  %p3124_p12 = scmp.lt.u32.totalorder %s3117_s21, %s4906_s19 }
  0x39   : > { %p3120_p10 = pnand %p3984_p9, %p3118_p8 }
  0x3b   : > { %p3121_p11 = pneg %p3120_p10 }
  0x3d   : > { %p3126_p13 = pnand %p3124_p12, %p3121_p11 }
  0x3f   : > { %3129 = shalt.err (!%p3126_p13)
}
  0x40   : > { %s3130_s27 = scalar_lea.vmem %s596_s3, 32  ;;  %p3138_p6 = scmp.lt.s32.totalorder %s596_s3, %s596_s3 }
  0x41   : > { %p3131_p0 = scmp.ne.s32.totalorder %s596_s3, %s3130_s27  ;;  %p3139_p1 = scmp.lt.s32.totalorder %s3130_s27, %s3130_s27 }
  0x43   : > { %p3133_p2 = pnand %p3131_p0, %p3984_p9  ;;  %p3140_p4 = por %p3139_p1, %p3138_p6 }
  0x45   : > { %p3134_p3 = pneg %p3133_p2 }
  0x47   : > { %p3141_p5 = pnand %p3140_p4, %p3134_p3 }
  0x49   : > { %3144 = shalt.err (!%p3141_p5)
}
  0x4a   : > { %s4859_s16 = smov 16   ;;  %s4860_s23 = smov 1  }
  0x4b   : > { %2932 = dma.hbm_to_vmem [thread:$0]  (!%p3972_p7), %s4906_s19, 32, %s596_s3, [#allocation7], %s4859_s16, %s4859_s16, %s4860_s23  }
  0x4c   : > { %s3795_s24 = smov [#allocation30]   ;;  %s4908_s14 = sld [smem:[#allocation54_spill]] }
  0x4d   : > { %s644_s29 = sshll.u32 %s3795_s24, 4  ;;  %s645_s29 = int_to_ptr.vmem [resolvable:$true] %s644_s29 }
  0x52   : > { %s3145_s12 = scalar_lea.hbm %s4908_s14, 128 }
  0x53   : > { %p3146_p1 = scmp.ne.s32.totalorder %s4908_s14, %s3145_s12  ;;  %p3152_p8 = scmp.lt.u32.totalorder %s3145_s12, %s4908_s14 }
  0x55   : > { %p3148_p4 = pnand %p3146_p1, %p3984_p9 }
  0x57   : > { %p3149_p5 = pneg %p3148_p4 }
  0x59   : > { %p3154_p10 = pnand %p3152_p8, %p3149_p5 }
  0x5b   : > { %3157 = shalt.err (!%p3154_p10)
}
  0x5c   : > { %s3158_s3 = scalar_lea.vmem %s620_s28, 128  ;;  %p3166_p0 = scmp.lt.s32.totalorder %s620_s28, %s620_s28 }
  0x5d   : > { %p3159_p11 = scmp.ne.s32.totalorder %s620_s28, %s3158_s3  ;;  %p3167_p2 = scmp.lt.s32.totalorder %s3158_s3, %s3158_s3 }
  0x5f   : > { %p3161_p12 = pnand %p3159_p11, %p3984_p9  ;;  %p3168_p3 = por %p3167_p2, %p3166_p0 }
  0x61   : > { %p3162_p13 = pneg %p3161_p12 }
  0x63   : > { %p3169_p6 = pnand %p3168_p3, %p3162_p13 }
  0x65   : > { %3172 = shalt.err (!%p3169_p6)
}
  0x66   : > { %s4861_s8 = smov 64   ;;  %s4863_s10 = smov 4  }
  0x67   : > { %2938 = dma.hbm_to_vmem [thread:$0]  (!%p3972_p7), %s4908_s14, 128, %s620_s28, [#allocation10], %s4861_s8, %s4861_s8, %s4863_s10  }
  0x68   : > { %s4909_s17 = sld [smem:[#allocation66_spill]] }
  0x6e   : > { %s3173_s2 = scalar_lea.hbm %s4909_s17, 16 }
  0x6f   : > { %p3174_p1 = scmp.ne.s32.totalorder %s4909_s17, %s3173_s2  ;;  %p3180_p8 = scmp.lt.u32.totalorder %s3173_s2, %s4909_s17 }
  0x71   : > { %p3176_p4 = pnand %p3174_p1, %p3984_p9 }
  0x73   : > { %p3177_p5 = pneg %p3176_p4 }
  0x75   : > { %p3182_p10 = pnand %p3180_p8, %p3177_p5 }
  0x77   : > { %3185 = shalt.err (!%p3182_p10)
}
  0x78   : > { %s3186_s6 = scalar_lea.vmem %s645_s29, 16  ;;  %s3193_s28 = scalar_lea.vmem %s645_s29, 32 }
  0x79   : > { %p3187_p11 = scmp.ne.s32.totalorder %s645_s29, %s3186_s6  ;;  %p3194_p0 = scmp.lt.s32.totalorder %s645_s29, %s645_s29 }
  0x7a   : > { %p3195_p2 = scmp.lt.s32.totalorder %s3193_s28, %s3186_s6 }
  0x7b   : > { %p3189_p12 = pnand %p3187_p11, %p3984_p9 }
  0x7c   : > { %p3196_p3 = por %p3195_p2, %p3194_p0 }
  0x7d   : > { %p3190_p13 = pneg %p3189_p12 }
  0x7f   : > { %p3197_p6 = pnand %p3196_p3, %p3190_p13 }
  0x81   : > { %3200 = shalt.err (!%p3197_p6)
}
  0x82   : > { %2944 = dma.hbm_to_vmem [thread:$0]  (!%p3972_p7), %s4909_s17, 16, %s645_s29, [#allocation31]  }
  0x83   : > { %s186_s21 = sadd.s32 1, %s3777_s20  ;;  %s61_s2 = sadd.s32 1, %s3785_s1 }
  0x84   : > { %p193_p1 = scmp.ne.s32.totalorder %s3777_s20, %s3773_s30  ;;  %p62_p4 = scmp.ge.s32.totalorder %s61_s2, 2 }
  0x85   : > { %p194_p5 = scmp.eq.s32.totalorder %s3789_s22, 0  ;;  %p2992_p8 = scmp.lt.s32.totalorder %s3789_s22, 2 }
  0x86   : > { %s4049_s24 = sand.u32 1, %s3789_s22   ;;  %s4981_s2 = smov (%p62_p4, %s61_s2), 0 }
  0x87   : > { %4910 = sst [smem:[#allocation49_spill]] %s4981_s2  ;;  %p195_p10 = por %p194_p5, %p193_p1 }
  0x88   : > { %s183_s0 = ssub.s32 %s3785_s1, %s4981_s2  ;;  %s4056_s27 = sand.u32 1, %s3777_s20  }
  0x89   : > { %p184_p11 = scmp.eq.s32.totalorder %s183_s0, 0  ;;  %s2864_s29 = smul.u32 48, %s4056_s27 }
  0x8a   : > { %s2865_s3 = smul.u32 768, %s3785_s1  ;;  %p4060_p12 = pnand %p2992_p8, %p195_p10 }
  0x8b   : > { %s4065_s28 = scalar_select %p184_p11, %s3777_s20, %s186_s21  }
  0x8c   : > { %s4911_s6 = scalar_select %p4060_p12, 1, 0 }
  0x8d   : > { %4912 = sst [smem:[#allocation50_spill]] %s4065_s28  ;;  %s4913_s5 = sld [smem:[#allocation55_spill]] }
  0x8e   : > { %s670_s23 = scalar_lea.vmem [#allocation12], %s2864_s29  ;;  %p4079_p0 = pneg %p4060_p12 }
  0x8f   : > { %s677_s0 = sshll.u32 %s670_s23, 4  ;;  %s4072_s0 = int_to_ptr.vmem [resolvable:$true] %s677_s0 }
  0x90   : > { %s4914_s21 = scalar_select %p4079_p0, 1, 0 }
  0x93   : > { %s4070_s16 = scalar_lea.hbm %s4913_s5, %s2865_s3  ;;  %s3206_s18 = scalar_lea.hbm %s4913_s5, 1536 }
  0x94   : > { %s3201_s10 = scalar_lea.hbm %s4070_s16, 768  ;;  %p3207_p6 = scmp.lt.u32.totalorder %s4070_s16, %s4913_s5 }
  0x95   : > { %p3202_p13 = scmp.ne.s32.totalorder %s4070_s16, %s3201_s10  ;;  %p3208_p1 = scmp.lt.u32.totalorder %s3206_s18, %s3201_s10 }
  0x96   : > { %p3210_p5 = scmp.lt.u32.totalorder %s3201_s10, %s4070_s16 }
  0x97   : > { %p3204_p2 = pnand %p4079_p0, %p3202_p13  ;;  %p3209_p4 = por %p3208_p1, %p3207_p6 }
  0x99   : > { %p3205_p3 = pneg %p3204_p2  ;;  %p3211_p8 = por %p3210_p5, %p3209_p4 }
  0x9b   : > { %p3212_p10 = pnand %p3211_p8, %p3205_p3 }
  0x9d   : > { %3215 = shalt.err (!%p3212_p10)
}
  0x9e   : > { %s3216_s8 = scalar_lea.vmem %s4072_s0, 768  ;;  %s3798_s3 = smov [#allocation12]  }
  0x9f   : > { %p3217_p11 = scmp.ne.s32.totalorder %s4072_s0, %s3216_s8  ;;  %s3221_s12 = sshll.u32 %s3798_s3, 4  ;;  %s3222_s12 = int_to_ptr.vmem [resolvable:$false] %s3221_s12 }
  0xa0   : > { %s3223_s29 = scalar_lea.vmem %s3222_s12, 1536  ;;  %p3224_p7 = scmp.lt.s32.totalorder %s4072_s0, %s3222_s12 }
  0xa1   : > { %p3219_p13 = pnand %p3217_p11, %p4079_p0  ;;  %p3225_p9 = scmp.lt.s32.totalorder %s3223_s29, %s3216_s8 }
  0xa3   : > { %p3220_p2 = pneg %p3219_p13  ;;  %p3226_p6 = por %p3225_p9, %p3224_p7 }
  0xa5   : > { %p3227_p1 = pnand %p3226_p6, %p3220_p2 }
  0xa7   : > { %3230 = shalt.err (!%p3227_p1)
}
  0xa8   : > { %s4915_s10 = smov 4   ;;  %s4916_s18 = smov 64  }
  0xa9   : > { %s4917_s23 = scalar_lea.sflag [#allocation13], %s4049_s24  ;;  %s4108_s3 = sshll.u32 %s4056_s27, 4 }
  0xaa   : > { %2951 = dma.hbm_to_vmem [thread:$0]  (!%p4060_p12), %s4070_s16, 768, %s4072_s0, %s4917_s23, %s4916_s18, %s4916_s18, %s4915_s10  }
  0xab   : > { %s4111_s8 = sshll.u32 %s3785_s1, 8  ;;  %s4918_s7 = sld [smem:[#allocation57_spill]] }
  0xac   : > { %s712_s14 = scalar_lea.vmem [#allocation15], %s4108_s3  ;;  %s4121_s19 = sshll.u32 %s3785_s1, 4 }
  0xad   : > { %s719_s17 = sshll.u32 %s712_s14, 4  ;;  %s4872_s16 = scalar_lea.sflag [#allocation16], %s4049_s24  ;;  %s4123_s17 = int_to_ptr.vmem [resolvable:$true] %s719_s17 }
  0xb1   : > { %s4117_s5 = scalar_lea.hbm %s4918_s7, %s4111_s8  ;;  %s3236_s29 = scalar_lea.hbm %s4918_s7, 512 }
  0xb2   : > { %s3231_s0 = scalar_lea.hbm %s4117_s5, 256  ;;  %p3237_p4 = scmp.lt.u32.totalorder %s4117_s5, %s4918_s7 }
  0xb3   : > { %p3232_p7 = scmp.ne.s32.totalorder %s4117_s5, %s3231_s0  ;;  %p3238_p5 = scmp.lt.u32.totalorder %s3236_s29, %s3231_s0 }
  0xb4   : > { %p3240_p10 = scmp.lt.u32.totalorder %s3231_s0, %s4117_s5 }
  0xb5   : > { %p3234_p9 = pnand %p3232_p7, %p4079_p0  ;;  %p3239_p8 = por %p3238_p5, %p3237_p4 }
  0xb7   : > { %p3235_p3 = pneg %p3234_p9  ;;  %p3241_p11 = por %p3240_p10, %p3239_p8 }
  0xb9   : > { %p3242_p13 = pnand %p3241_p11, %p3235_p3 }
  0xbb   : > { %3245 = shalt.err (!%p3242_p13)
}
  0xbc   : > { %s3246_s14 = scalar_lea.vmem %s4123_s17, 256  ;;  %s3799_s23 = smov [#allocation15]  }
  0xbd   : > { %p3247_p2 = scmp.ne.s32.totalorder %s4123_s17, %s3246_s14  ;;  %s3251_s12 = sshll.u32 %s3799_s23, 4  ;;  %s3252_s12 = int_to_ptr.vmem [resolvable:$false] %s3251_s12 }
  0xbe   : > { %s3253_s2 = scalar_lea.vmem %s3252_s12, 512  ;;  %p3254_p7 = scmp.lt.s32.totalorder %s4123_s17, %s3252_s12 }
  0xbf   : > { %p3249_p6 = pnand %p3247_p2, %p4079_p0  ;;  %p3255_p9 = scmp.lt.s32.totalorder %s3253_s2, %s3246_s14 }
  0xc1   : > { %p3250_p1 = pneg %p3249_p6  ;;  %p3256_p4 = por %p3255_p9, %p3254_p7 }
  0xc3   : > { %p3257_p5 = pnand %p3256_p4, %p3250_p1 }
  0xc5   : > { %3260 = shalt.err (!%p3257_p5)
}
  0xc6   : > { %2957 = dma.hbm_to_vmem [thread:$0]  (!%p4060_p12), %s4117_s5, 256, %s4123_s17, %s4872_s16, %s4916_s18, %s4916_s18, %s4915_s10  }
  0xc7   : > { %s4919_s9 = sld [smem:[#allocation59_spill]]  ;;  %s749_s14 = scalar_lea.vmem [#allocation18], %s4056_s27 }
  0xc8   : > { %s756_s23 = sshll.u32 %s749_s14, 4  ;;  %s757_s23 = int_to_ptr.vmem [resolvable:$true] %s756_s23 }
  0xcd   : > { %s4156_s29 = scalar_lea.hbm %s4919_s9, %s4121_s19  ;;  %s3266_s17 = scalar_lea.hbm %s4919_s9, 32 }
  0xce   : > { %s3261_s2 = scalar_lea.hbm %s4156_s29, 16  ;;  %p3267_p11 = scmp.lt.u32.totalorder %s4156_s29, %s4919_s9 }
  0xcf   : > { %p3262_p3 = scmp.ne.s32.totalorder %s4156_s29, %s3261_s2  ;;  %p3268_p13 = scmp.lt.u32.totalorder %s3266_s17, %s3261_s2 }
  0xd0   : > { %p3270_p6 = scmp.lt.u32.totalorder %s3261_s2, %s4156_s29 }
  0xd1   : > { %p3264_p8 = pnand %p3262_p3, %p4079_p0  ;;  %p3269_p2 = por %p3268_p13, %p3267_p11 }
  0xd3   : > { %p3265_p10 = pneg %p3264_p8  ;;  %p3271_p1 = por %p3270_p6, %p3269_p2 }
  0xd5   : > { %p3272_p7 = pnand %p3271_p1, %p3265_p10 }
  0xd7   : > { %3275 = shalt.err (!%p3272_p7)
}
  0xd8   : > { %s3276_s14 = scalar_lea.vmem %s757_s23, 16  ;;  %s3800_s16 = smov [#allocation18]  }
  0xd9   : > { %p3277_p9 = scmp.ne.s32.totalorder %s757_s23, %s3276_s14  ;;  %s3281_s12 = sshll.u32 %s3800_s16, 4  ;;  %s3282_s12 = int_to_ptr.vmem [resolvable:$false] %s3281_s12 }
  0xda   : > { %s3283_s7 = scalar_lea.vmem %s3282_s12, 32  ;;  %p3284_p3 = scmp.lt.s32.totalorder %s757_s23, %s3282_s12 }
  0xdb   : > { %p3279_p4 = pnand %p3277_p9, %p4079_p0  ;;  %p3285_p8 = scmp.lt.s32.totalorder %s3283_s7, %s3276_s14 }
  0xdd   : > { %p3280_p5 = pneg %p3279_p4  ;;  %p3286_p12 = por %p3285_p8, %p3284_p3 }
  0xdf   : > { %p3287_p11 = pnand %p3286_p12, %p3280_p5 }
  0xe1   : > { %3290 = shalt.err (!%p3287_p11)
}
  0xe2   : > { %p4920_p13 = scmp.ne.s32.totalorder %s4911_s6, 0  ;;  %s4921_s2 = scalar_lea.sflag [#allocation19], %s4049_s24 }
  0xe3   : > { %s4922_s11 = sld [smem:[#allocation61_spill]]  ;;  %s784_s12 = scalar_lea.vmem [#allocation21], %s4108_s3 }
  0xe4   : > { %2963 = dma.hbm_to_vmem [thread:$0]  (!%p4920_p13), %s4156_s29, 16, %s757_s23, %s4921_s2  }
  0xe5   : > { %s791_s28 = sshll.u32 %s784_s12, 4  ;;  %s4877_s0 = scalar_lea.sflag [#allocation22], %s4049_s24  ;;  %s4186_s28 = int_to_ptr.vmem [resolvable:$true] %s791_s28 }
  0xe9   : > { %s4183_s16 = scalar_lea.hbm %s4922_s11, %s4111_s8  ;;  %s3296_s7 = scalar_lea.hbm %s4922_s11, 512 }
  0xea   : > { %s3291_s14 = scalar_lea.hbm %s4183_s16, 256  ;;  %p3297_p6 = scmp.lt.u32.totalorder %s4183_s16, %s4922_s11 }
  0xeb   : > { %p3292_p12 = scmp.ne.s32.totalorder %s4183_s16, %s3291_s14  ;;  %p3298_p1 = scmp.lt.u32.totalorder %s3296_s7, %s3291_s14 }
  0xec   : > { %p3300_p9 = scmp.lt.u32.totalorder %s3291_s14, %s4183_s16 }
  0xed   : > { %p3294_p10 = pnand %p3292_p12, %p4079_p0  ;;  %p3299_p7 = por %p3298_p1, %p3297_p6 }
  0xef   : > { %p3295_p2 = pneg %p3294_p10  ;;  %p3301_p4 = por %p3300_p9, %p3299_p7 }
  0xf1   : > { %p3302_p5 = pnand %p3301_p4, %p3295_p2 }
  0xf3   : > { %3305 = shalt.err (!%p3302_p5)
}
  0xf4   : > { %s3306_s17 = scalar_lea.vmem %s4186_s28, 256  ;;  %s3801_s12 = smov [#allocation21]  }
  0xf5   : > { %p3307_p3 = scmp.ne.s32.totalorder %s4186_s28, %s3306_s17  ;;  %s3311_s29 = sshll.u32 %s3801_s12, 4  ;;  %s3312_s29 = int_to_ptr.vmem [resolvable:$false] %s3311_s29 }
  0xf6   : > { %s3313_s23 = scalar_lea.vmem %s3312_s29, 512  ;;  %p3314_p12 = scmp.lt.s32.totalorder %s4186_s28, %s3312_s29 }
  0xf7   : > { %p3309_p8 = pnand %p3307_p3, %p4079_p0  ;;  %p3315_p10 = scmp.lt.s32.totalorder %s3313_s23, %s3306_s17 }
  0xf9   : > { %p3310_p11 = pneg %p3309_p8  ;;  %p3316_p6 = por %p3315_p10, %p3314_p12 }
  0xfb   : > { %p3317_p1 = pnand %p3316_p6, %p3310_p11 }
  0xfd   : > { %3320 = shalt.err (!%p3317_p1)
}
  0xfe   : > { %2969 = dma.hbm_to_vmem [thread:$0]  (!%p4920_p13), %s4183_s16, 256, %s4186_s28, %s4877_s0, %s4916_s18, %s4916_s18, %s4915_s10  }
  0xff   : > { %s4923_s13 = sld [smem:[#allocation63_spill]]  ;;  %s822_s5 = scalar_lea.vmem [#allocation24], %s4108_s3 }
 0x100   : > { %s829_s17 = sshll.u32 %s822_s5, 4  ;;  %s4875_s12 = scalar_lea.sflag [#allocation25], %s4049_s24  ;;  %s4222_s17 = int_to_ptr.vmem [resolvable:$true] %s829_s17 }
 0x105   : > { %s4219_s2 = scalar_lea.hbm %s4923_s13, %s4111_s8  ;;  %s3326_s23 = scalar_lea.hbm %s4923_s13, 512 }
 0x106   : > { %s3321_s29 = scalar_lea.hbm %s4219_s2, 256  ;;  %p3327_p4 = scmp.lt.u32.totalorder %s4219_s2, %s4923_s13 }
 0x107   : > { %p3322_p2 = scmp.ne.s32.totalorder %s4219_s2, %s3321_s29  ;;  %p3328_p5 = scmp.lt.u32.totalorder %s3326_s23, %s3321_s29 }
 0x108   : > { %p3330_p8 = scmp.lt.u32.totalorder %s3321_s29, %s4219_s2 }
 0x109   : > { %p3324_p7 = pnand %p3322_p2, %p4079_p0  ;;  %p3329_p3 = por %p3328_p5, %p3327_p4 }
 0x10b   : > { %p3325_p9 = pneg %p3324_p7  ;;  %p3331_p11 = por %p3330_p8, %p3329_p3 }
 0x10d   : > { %p3332_p12 = pnand %p3331_p11, %p3325_p9 }
 0x10f   : > { %3335 = shalt.err (!%p3332_p12)
}
 0x110   : > { %s3336_s3 = scalar_lea.vmem %s4222_s17, 256  ;;  %s3802_s7 = smov [#allocation24]  }
 0x111   : > { %p3337_p10 = scmp.ne.s32.totalorder %s4222_s17, %s3336_s3  ;;  %s3341_s5 = sshll.u32 %s3802_s7, 4  ;;  %s3342_s5 = int_to_ptr.vmem [resolvable:$false] %s3341_s5 }
 0x112   : > { %s3343_s16 = scalar_lea.vmem %s3342_s5, 512  ;;  %p3344_p2 = scmp.lt.s32.totalorder %s4222_s17, %s3342_s5 }
 0x113   : > { %p3339_p6 = pnand %p3337_p10, %p4079_p0  ;;  %p3345_p7 = scmp.lt.s32.totalorder %s3343_s16, %s3336_s3 }
 0x115   : > { %p3340_p1 = pneg %p3339_p6  ;;  %p3346_p4 = por %p3345_p7, %p3344_p2 }
 0x117   : > { %p3347_p5 = pnand %p3346_p4, %p3340_p1 }
 0x119   : > { %3350 = shalt.err (!%p3347_p5)
}
 0x11a   : > { %2975 = dma.hbm_to_vmem [thread:$0]  (!%p4920_p13), %s4219_s2, 256, %s4222_s17, %s4875_s12, %s4916_s18, %s4916_s18, %s4915_s10  }
 0x11b   : > { %s4255_s23 = scalar_lea.hbm %s4833_s15, %s4121_s19  ;;  %s859_s8 = scalar_lea.vmem [#allocation27], %s4056_s27 }
 0x11c   : > { %s866_s14 = sshll.u32 %s859_s8, 4  ;;  %s4880_s3 = scalar_lea.sflag [#allocation28], %s4049_s24  ;;  %s867_s14 = int_to_ptr.vmem [resolvable:$true] %s866_s14 }
 0x11d   : > { %s3351_s7 = scalar_lea.hbm %s4255_s23, 16  ;;  %s3356_s17 = scalar_lea.hbm %s4833_s15, 32 }
 0x11e   : > { %p3352_p9 = scmp.ne.s32.totalorder %s4255_s23, %s3351_s7  ;;  %p3357_p11 = scmp.lt.u32.totalorder %s4255_s23, %s4833_s15 }
 0x11f   : > { %p3358_p12 = scmp.lt.u32.totalorder %s3356_s17, %s3351_s7  ;;  %p3360_p6 = scmp.lt.u32.totalorder %s3351_s7, %s4255_s23 }
 0x120   : > { %p3354_p3 = pnand %p3352_p9, %p4079_p0 }
 0x121   : > { %p3359_p10 = por %p3358_p12, %p3357_p11 }
 0x122   : > { %p3355_p8 = pneg %p3354_p3 }
 0x123   : > { %p3361_p1 = por %p3360_p6, %p3359_p10 }
 0x125   : > { %p3362_p2 = pnand %p3361_p1, %p3355_p8 }
 0x127   : > { %3365 = shalt.err (!%p3362_p2)
}
 0x128   : > { %s3366_s28 = scalar_lea.vmem %s867_s14, 16  ;;  %s3803_s8 = smov [#allocation27]  }
 0x129   : > { %p3367_p7 = scmp.ne.s32.totalorder %s867_s14, %s3366_s28  ;;  %s3371_s12 = sshll.u32 %s3803_s8, 4  ;;  %s3372_s12 = int_to_ptr.vmem [resolvable:$false] %s3371_s12 }
 0x12a   : > { %s3373_s5 = scalar_lea.vmem %s3372_s12, 32  ;;  %p3374_p9 = scmp.lt.s32.totalorder %s867_s14, %s3372_s12 }
 0x12b   : > { %p3369_p4 = pnand %p3367_p7, %p4079_p0  ;;  %p3375_p3 = scmp.lt.s32.totalorder %s3373_s5, %s3366_s28 }
 0x12d   : > { %p3370_p5 = pneg %p3369_p4  ;;  %p3376_p13 = por %p3375_p3, %p3374_p9 }
 0x12f   : > { %p3377_p11 = pnand %p3376_p13, %p3370_p5 }
 0x131   : > { %3380 = shalt.err (!%p3377_p11)
}
 0x132   : > { %p4924_p12 = scmp.ne.s32.totalorder %s4911_s6, 0  ;;  %s3804_s7 = smov [#allocation3]  }
 0x133   : > { %s579_s2 = sshll.u32 %s3804_s7, 4  ;;  %s3805_s17 = smov [#allocation8]   ;;  %s580_s2 = int_to_ptr.vmem [resolvable:$true] %s579_s2 }
 0x134   : > { %2981 = dma.hbm_to_vmem [thread:$0]  (!%p4924_p12), %s4255_s23, 16, %s867_s14, %s4880_s3  }
 0x135   : > { %s609_s16 = sshll.u32 %s3805_s17, 4  ;;  %s4925_s0 = sld [smem:[#allocation51_spill]]  ;;  %s610_s16 = int_to_ptr.vmem [resolvable:$true] %s609_s16 }
 0x136   : > { %p4927_p8 = scmp.ne.s32.totalorder %s4907_s25, 0 }
 0x13b   : > { %s4926_s9 = smov %s4925_s0  ;;  %s3381_s12 = scalar_lea.hbm %s4925_s0, 128 }
 0x13c   : > { %p3382_p13 = scmp.ne.s32.totalorder %s4926_s9, %s3381_s12  ;;  %p3388_p1 = scmp.lt.u32.totalorder %s3381_s12, %s4926_s9 }
 0x13e   : > { %p3384_p10 = pnand %p3382_p13, %p4927_p8 }
 0x140   : > { %p3385_p6 = pneg %p3384_p10 }
 0x142   : > { %p3390_p2 = pnand %p3388_p1, %p3385_p6 }
 0x144   : > { %3393 = shalt.err (!%p3390_p2)
}
 0x145   : > { %s3394_s23 = scalar_lea.vmem %s580_s2, 128  ;;  %p3402_p9 = scmp.lt.s32.totalorder %s580_s2, %s580_s2 }
 0x146   : > { %p3395_p7 = scmp.ne.s32.totalorder %s580_s2, %s3394_s23  ;;  %p3403_p3 = scmp.lt.s32.totalorder %s3394_s23, %s3394_s23 }
 0x148   : > { %p3397_p4 = pnand %p3395_p7, %p4927_p8  ;;  %p3404_p11 = por %p3403_p3, %p3402_p9 }
 0x14a   : > { %p3398_p5 = pneg %p3397_p4 }
 0x14c   : > { %p3405_p12 = pnand %p3404_p11, %p3398_p5 }
 0x14e   : > { %3408 = shalt.err (!%p3405_p12)
}
 0x14f   : > { %p4928_p13 = scmp.ne.s32.totalorder %s4905_s26, 0  ;;  %s4929_s7 = sld [smem:[#allocation53_spill]] }
 0x151   : > { %2929 = dma.hbm_to_vmem [thread:$0]  (!%p4928_p13), %s4926_s9, 128, %s580_s2, [#allocation4], %s4916_s18, %s4916_s18, %s4915_s10  }
 0x155   : > { %s3409_s17 = scalar_lea.hbm %s4929_s7, 128 }
 0x156   : > { %p3410_p10 = scmp.ne.s32.totalorder %s4929_s7, %s3409_s17  ;;  %p3416_p1 = scmp.lt.u32.totalorder %s3409_s17, %s4929_s7 }
 0x158   : > { %p3412_p12 = pnand %p3410_p10, %p4927_p8 }
 0x15a   : > { %p3413_p6 = pneg %p3412_p12 }
 0x15c   : > { %p3418_p2 = pnand %p3416_p1, %p3413_p6 }
 0x15e   : > { %3421 = shalt.err (!%p3418_p2)
}
 0x15f   : > { %s3422_s5 = scalar_lea.vmem %s610_s16, 128  ;;  %p3430_p9 = scmp.lt.s32.totalorder %s610_s16, %s610_s16 }
 0x160   : > { %p3423_p7 = scmp.ne.s32.totalorder %s610_s16, %s3422_s5  ;;  %p3431_p3 = scmp.lt.s32.totalorder %s3422_s5, %s3422_s5 }
 0x162   : > { %p3425_p4 = pnand %p3423_p7, %p4927_p8  ;;  %p3432_p11 = por %p3431_p3, %p3430_p9 }
 0x164   : > { %p3426_p5 = pneg %p3425_p4 }
 0x166   : > { %p3433_p0 = pnand %p3432_p11, %p3426_p5 }
 0x168   : > { %3436 = shalt.err (!%p3433_p0)
}
 0x169   : > { %2935 = dma.hbm_to_vmem [thread:$0]  (!%p4928_p13), %s4929_s7, 128, %s610_s16, [#allocation7]  }
 0x16a   : > { %s3806_s2 = smov [#allocation11]   ;;  %s3807_s11 = smov [#allocation32]  }
 0x16b   : > { %s633_s23 = sshll.u32 %s3806_s2, 4  ;;  %s655_s13 = sshll.u32 %s3807_s11, 4  ;;  %s634_s23 = int_to_ptr.vmem [resolvable:$true] %s633_s23  ;;  %s656_s13 = int_to_ptr.vmem [resolvable:$true] %s655_s13 }
 0x16c   : > { %s3437_s17 = scalar_lea.hbm %s4822_s4, 16 }
 0x16d   : > { %p3438_p0 = scmp.ne.s32.totalorder %s4822_s4, %s3437_s17  ;;  %p3444_p6 = scmp.lt.u32.totalorder %s3437_s17, %s4822_s4 }
 0x16f   : > { %p3440_p10 = pnand %p3438_p0, %p4927_p8 }
 0x171   : > { %p3441_p12 = pneg %p3440_p10 }
 0x173   : > { %p3446_p1 = pnand %p3444_p6, %p3441_p12 }
 0x175   : > { %3449 = shalt.err (!%p3446_p1)
}
 0x176   : > { %s3450_s16 = scalar_lea.vmem %s634_s23, 16  ;;  %s3457_s5 = scalar_lea.vmem %s634_s23, 32 }
 0x177   : > { %p3451_p2 = scmp.ne.s32.totalorder %s634_s23, %s3450_s16  ;;  %p3458_p5 = scmp.lt.s32.totalorder %s634_s23, %s634_s23 }
 0x178   : > { %p3459_p9 = scmp.lt.s32.totalorder %s3457_s5, %s3450_s16 }
 0x179   : > { %p3453_p7 = pnand %p3451_p2, %p4927_p8 }
 0x17a   : > { %p3460_p3 = por %p3459_p9, %p3458_p5 }
 0x17b   : > { %p3454_p4 = pneg %p3453_p7 }
 0x17d   : > { %p3461_p11 = pnand %p3460_p3, %p3454_p4 }
 0x17f   : > { %3464 = shalt.err (!%p3461_p11)
}
 0x180   : > { %2941 = dma.hbm_to_vmem [thread:$0]  (!%p4928_p13), %s4822_s4, 16, %s634_s23, [#allocation10]  }
 0x181   : > { %s2866_s2 = smul.u32 3, %s4056_s27  ;;  %s4930_s14 = sld [smem:[#allocation67_spill]] }
 0x187   : > { %s3465_s17 = scalar_lea.hbm %s4930_s14, 16 }
 0x188   : > { %p3466_p0 = scmp.ne.s32.totalorder %s4930_s14, %s3465_s17  ;;  %p3472_p6 = scmp.lt.u32.totalorder %s3465_s17, %s4930_s14 }
 0x18a   : > { %p3468_p10 = pnand %p3466_p0, %p4927_p8 }
 0x18c   : > { %p3469_p12 = pneg %p3468_p10 }
 0x18e   : > { %p3474_p1 = pnand %p3472_p6, %p3469_p12 }
 0x190   : > { %3477 = shalt.err (!%p3474_p1)
}
 0x191   : > { %s3478_s23 = scalar_lea.vmem %s656_s13, 16  ;;  %s3485_s16 = scalar_lea.vmem %s656_s13, 32 }
 0x192   : > { %p3479_p2 = scmp.ne.s32.totalorder %s656_s13, %s3478_s23  ;;  %p3486_p5 = scmp.lt.s32.totalorder %s656_s13, %s656_s13 }
 0x193   : > { %p3487_p9 = scmp.lt.s32.totalorder %s3485_s16, %s3478_s23 }
 0x194   : > { %p3481_p7 = pnand %p3479_p2, %p4927_p8 }
 0x195   : > { %p3488_p3 = por %p3487_p9, %p3486_p5 }
 0x196   : > { %p3482_p4 = pneg %p3481_p7 }
 0x198   : > { %p3489_p11 = pnand %p3488_p3, %p3482_p4 }
 0x19a   : > { %3492 = shalt.err (!%p3489_p11)
}
 0x19b   : > { %2947 = dma.hbm_to_vmem [thread:$0]  (!%p4928_p13), %s4930_s14, 16, %s656_s13, [#allocation31]  }
 0x19c   : > { %s2867_s18 = smul.u32 48, %s3785_s1  ;;  %s691_s11 = scalar_lea.vmem [#allocation14], %s2866_s2 }
 0x19d   : > { %s698_s0 = sshll.u32 %s691_s11, 4  ;;  %s4931_s29 = sld [smem:[#allocation56_spill]]  ;;  %s4360_s0 = int_to_ptr.vmem [resolvable:$true] %s698_s0 }
 0x19e   : > { %p4932_p0 = scmp.ne.s32.totalorder %s4914_s21, 0 }
 0x1a3   : > { %s4358_s8 = scalar_lea.hbm %s4931_s29, %s2867_s18  ;;  %s3498_s2 = scalar_lea.hbm %s4931_s29, 96 }
 0x1a4   : > { %s3493_s26 = scalar_lea.hbm %s4358_s8, 48  ;;  %p3499_p13 = scmp.lt.u32.totalorder %s4358_s8, %s4931_s29 }
 0x1a5   : > { %p3494_p8 = scmp.ne.s32.totalorder %s4358_s8, %s3493_s26  ;;  %p3500_p6 = scmp.lt.u32.totalorder %s3498_s2, %s3493_s26 }
 0x1a6   : > { %p3502_p2 = scmp.lt.u32.totalorder %s3493_s26, %s4358_s8 }
 0x1a7   : > { %p3496_p10 = pnand %p3494_p8, %p4932_p0  ;;  %p3501_p1 = por %p3500_p6, %p3499_p13 }
 0x1a9   : > { %p3497_p12 = pneg %p3496_p10  ;;  %p3503_p7 = por %p3502_p2, %p3501_p1 }
 0x1ab   : > { %p3504_p4 = pnand %p3503_p7, %p3497_p12 }
 0x1ad   : > { %3507 = shalt.err (!%p3504_p4)
}
 0x1ae   : > { %s3508_s16 = scalar_lea.vmem %s4360_s0, 48  ;;  %s3808_s5 = smov [#allocation14]  }
 0x1af   : > { %p3509_p5 = scmp.ne.s32.totalorder %s4360_s0, %s3508_s16  ;;  %s3513_s10 = sshll.u32 %s3808_s5, 4  ;;  %s3514_s10 = int_to_ptr.vmem [resolvable:$false] %s3513_s10 }
 0x1b0   : > { %s3515_s18 = scalar_lea.vmem %s3514_s10, 96  ;;  %p3516_p11 = scmp.lt.s32.totalorder %s4360_s0, %s3514_s10 }
 0x1b1   : > { %p3511_p9 = pnand %p3509_p5, %p4932_p0  ;;  %p3517_p8 = scmp.lt.s32.totalorder %s3515_s18, %s3508_s16 }
 0x1b3   : > { %p3512_p3 = pneg %p3511_p9  ;;  %p3518_p10 = por %p3517_p8, %p3516_p11 }
 0x1b5   : > { %p3519_p13 = pnand %p3518_p10, %p3512_p3 }
 0x1b7   : > { %3522 = shalt.err (!%p3519_p13)
}
 0x1b8   : > { %p4933_p12 = scmp.ne.s32.totalorder %s4911_s6, 0  ;;  %s4934_s11 = smov 1  }
 0x1b9   : > { %s4935_s25 = smov 16   ;;  %s4936_s17 = scalar_lea.sflag [#allocation13], %s4049_s24 }
 0x1ba   : > { %2954 = dma.hbm_to_vmem [thread:$0]  (!%p4933_p12), %s4358_s8, 48, %s4360_s0, %s4936_s17, %s4935_s25, %s4935_s25, %s4934_s11  }
 0x1bb   : > { %s4937_s12 = sld [smem:[#allocation58_spill]]  ;;  %s732_s28 = scalar_lea.vmem [#allocation17], %s4056_s27 }
 0x1bc   : > { %s739_s23 = sshll.u32 %s732_s28, 4  ;;  %s740_s23 = int_to_ptr.vmem [resolvable:$true] %s739_s23 }
 0x1c1   : > { %s4392_s2 = scalar_lea.hbm %s4937_s12, %s4121_s19  ;;  %s3528_s0 = scalar_lea.hbm %s4937_s12, 32 }
 0x1c2   : > { %s3523_s16 = scalar_lea.hbm %s4392_s2, 16  ;;  %p3529_p7 = scmp.lt.u32.totalorder %s4392_s2, %s4937_s12 }
 0x1c3   : > { %p3524_p6 = scmp.ne.s32.totalorder %s4392_s2, %s3523_s16  ;;  %p3530_p4 = scmp.lt.u32.totalorder %s3528_s0, %s3523_s16 }
 0x1c4   : > { %p3532_p9 = scmp.lt.u32.totalorder %s3523_s16, %s4392_s2 }
 0x1c5   : > { %p3526_p1 = pnand %p3524_p6, %p4932_p0  ;;  %p3531_p5 = por %p3530_p4, %p3529_p7 }
 0x1c7   : > { %p3527_p2 = pneg %p3526_p1  ;;  %p3533_p3 = por %p3532_p9, %p3531_p5 }
 0x1c9   : > { %p3534_p11 = pnand %p3533_p3, %p3527_p2 }
 0x1cb   : > { %3537 = shalt.err (!%p3534_p11)
}
 0x1cc   : > { %s3538_s11 = scalar_lea.vmem %s740_s23, 16  ;;  %s3809_s25 = smov [#allocation17]  }
 0x1cd   : > { %p3539_p8 = scmp.ne.s32.totalorder %s740_s23, %s3538_s11  ;;  %s3543_s17 = sshll.u32 %s3809_s25, 4  ;;  %s3544_s17 = int_to_ptr.vmem [resolvable:$false] %s3543_s17 }
 0x1ce   : > { %s3545_s26 = scalar_lea.vmem %s3544_s17, 32  ;;  %p3546_p6 = scmp.lt.s32.totalorder %s740_s23, %s3544_s17 }
 0x1cf   : > { %p3541_p10 = pnand %p3539_p8, %p4932_p0  ;;  %p3547_p1 = scmp.lt.s32.totalorder %s3545_s26, %s3538_s11 }
 0x1d1   : > { %p3542_p13 = pneg %p3541_p10  ;;  %p3548_p12 = por %p3547_p1, %p3546_p6 }
 0x1d3   : > { %p3549_p4 = pnand %p3548_p12, %p3542_p13 }
 0x1d5   : > { %3552 = shalt.err (!%p3549_p4)
}
 0x1d6   : > { %p4938_p7 = scmp.ne.s32.totalorder %s4911_s6, 0  ;;  %s4939_s13 = scalar_lea.sflag [#allocation16], %s4049_s24 }
 0x1d7   : > { %s4940_s5 = sld [smem:[#allocation60_spill]]  ;;  %s766_s0 = scalar_lea.vmem [#allocation20], %s4056_s27 }
 0x1d8   : > { %2960 = dma.hbm_to_vmem [thread:$0]  (!%p4938_p7), %s4392_s2, 16, %s740_s23, %s4939_s13  }
 0x1d9   : > { %s773_s8 = sshll.u32 %s766_s0, 4  ;;  %s774_s8 = int_to_ptr.vmem [resolvable:$true] %s773_s8 }
 0x1dd   : > { %s4418_s10 = scalar_lea.hbm %s4940_s5, %s4121_s19  ;;  %s3558_s2 = scalar_lea.hbm %s4940_s5, 32 }
 0x1de   : > { %s3553_s18 = scalar_lea.hbm %s4418_s10, 16  ;;  %p3559_p9 = scmp.lt.u32.totalorder %s4418_s10, %s4940_s5 }
 0x1df   : > { %p3554_p12 = scmp.ne.s32.totalorder %s4418_s10, %s3553_s18  ;;  %p3560_p3 = scmp.lt.u32.totalorder %s3558_s2, %s3553_s18 }
 0x1e0   : > { %p3562_p8 = scmp.lt.u32.totalorder %s3553_s18, %s4418_s10 }
 0x1e1   : > { %p3556_p2 = pnand %p3554_p12, %p4932_p0  ;;  %p3561_p11 = por %p3560_p3, %p3559_p9 }
 0x1e3   : > { %p3557_p5 = pneg %p3556_p2  ;;  %p3563_p10 = por %p3562_p8, %p3561_p11 }
 0x1e5   : > { %p3564_p13 = pnand %p3563_p10, %p3557_p5 }
 0x1e7   : > { %3567 = shalt.err (!%p3564_p13)
}
 0x1e8   : > { %s3568_s26 = scalar_lea.vmem %s774_s8, 16  ;;  %s3810_s13 = smov [#allocation20]  }
 0x1e9   : > { %p3569_p6 = scmp.ne.s32.totalorder %s774_s8, %s3568_s26  ;;  %s3573_s28 = sshll.u32 %s3810_s13, 4  ;;  %s3574_s28 = int_to_ptr.vmem [resolvable:$false] %s3573_s28 }
 0x1ea   : > { %s3575_s16 = scalar_lea.vmem %s3574_s28, 32  ;;  %p3576_p12 = scmp.lt.s32.totalorder %s774_s8, %s3574_s28 }
 0x1eb   : > { %p3571_p1 = pnand %p3569_p6, %p4932_p0  ;;  %p3577_p2 = scmp.lt.s32.totalorder %s3575_s16, %s3568_s26 }
 0x1ed   : > { %p3572_p4 = pneg %p3571_p1  ;;  %p3578_p7 = por %p3577_p2, %p3576_p12 }
 0x1ef   : > { %p3579_p3 = pnand %p3578_p7, %p3572_p4 }
 0x1f1   : > { %3582 = shalt.err (!%p3579_p3)
}
 0x1f2   : > { %p4941_p9 = scmp.ne.s32.totalorder %s4911_s6, 0  ;;  %s4942_s0 = scalar_lea.sflag [#allocation19], %s4049_s24 }
 0x1f3   : > { %s4943_s25 = sld [smem:[#allocation62_spill]]  ;;  %s804_s23 = scalar_lea.vmem [#allocation23], %s4056_s27 }
 0x1f4   : > { %2966 = dma.hbm_to_vmem [thread:$0]  (!%p4941_p9), %s4418_s10, 16, %s774_s8, %s4942_s0  }
 0x1f5   : > { %s811_s17 = sshll.u32 %s804_s23, 4  ;;  %s812_s17 = int_to_ptr.vmem [resolvable:$true] %s811_s17 }
 0x1f9   : > { %s4444_s2 = scalar_lea.hbm %s4943_s25, %s4121_s19  ;;  %s3588_s10 = scalar_lea.hbm %s4943_s25, 32 }
 0x1fa   : > { %s3583_s26 = scalar_lea.hbm %s4444_s2, 16  ;;  %p3589_p8 = scmp.lt.u32.totalorder %s4444_s2, %s4943_s25 }
 0x1fb   : > { %p3584_p7 = scmp.ne.s32.totalorder %s4444_s2, %s3583_s26  ;;  %p3590_p10 = scmp.lt.u32.totalorder %s3588_s10, %s3583_s26 }
 0x1fc   : > { %p3592_p6 = scmp.lt.u32.totalorder %s3583_s26, %s4444_s2 }
 0x1fd   : > { %p3586_p5 = pnand %p3584_p7, %p4932_p0  ;;  %p3591_p13 = por %p3590_p10, %p3589_p8 }
 0x1ff   : > { %p3587_p11 = pneg %p3586_p5  ;;  %p3593_p1 = por %p3592_p6, %p3591_p13 }
 0x201   : > { %p3594_p4 = pnand %p3593_p1, %p3587_p11 }
 0x203   : > { %3597 = shalt.err (!%p3594_p4)
}
 0x204   : > { %s3598_s0 = scalar_lea.vmem %s812_s17, 16  ;;  %s3811_s18 = smov [#allocation23]  }
 0x205   : > { %p3599_p12 = scmp.ne.s32.totalorder %s812_s17, %s3598_s0  ;;  %s3603_s11 = sshll.u32 %s3811_s18, 4  ;;  %s3604_s11 = int_to_ptr.vmem [resolvable:$false] %s3603_s11 }
 0x206   : > { %s3605_s23 = scalar_lea.vmem %s3604_s11, 32  ;;  %p3606_p7 = scmp.lt.s32.totalorder %s812_s17, %s3604_s11 }
 0x207   : > { %p3601_p2 = pnand %p3599_p12, %p4932_p0  ;;  %p3607_p5 = scmp.lt.s32.totalorder %s3605_s23, %s3598_s0 }
 0x209   : > { %p3602_p3 = pneg %p3601_p2  ;;  %p3608_p9 = por %p3607_p5, %p3606_p7 }
 0x20b   : > { %p3609_p8 = pnand %p3608_p9, %p3602_p3 }
 0x20d   : > { %3612 = shalt.err (!%p3609_p8)
}
 0x20e   : > { %p4944_p10 = scmp.ne.s32.totalorder %s4911_s6, 0  ;;  %s4945_s26 = scalar_lea.sflag [#allocation22], %s4049_s24 }
 0x20f   : > { %s4946_s10 = sld [smem:[#allocation64_spill]]  ;;  %s842_s16 = scalar_lea.vmem [#allocation26], %s4056_s27 }
 0x210   : > { %2972 = dma.hbm_to_vmem [thread:$0]  (!%p4944_p10), %s4444_s2, 16, %s812_s17, %s4945_s26  }
 0x211   : > { %s849_s0 = sshll.u32 %s842_s16, 4  ;;  %s850_s0 = int_to_ptr.vmem [resolvable:$true] %s849_s0 }
 0x215   : > { %s4470_s8 = scalar_lea.hbm %s4946_s10, %s4121_s19  ;;  %s3618_s2 = scalar_lea.hbm %s4946_s10, 32 }
 0x216   : > { %s3613_s18 = scalar_lea.hbm %s4470_s8, 16  ;;  %p3619_p6 = scmp.lt.u32.totalorder %s4470_s8, %s4946_s10 }
 0x217   : > { %p3614_p9 = scmp.ne.s32.totalorder %s4470_s8, %s3613_s18  ;;  %p3620_p1 = scmp.lt.u32.totalorder %s3618_s2, %s3613_s18 }
 0x218   : > { %p3622_p12 = scmp.lt.u32.totalorder %s3613_s18, %s4470_s8 }
 0x219   : > { %p3616_p11 = pnand %p3614_p9, %p4932_p0  ;;  %p3621_p4 = por %p3620_p1, %p3619_p6 }
 0x21b   : > { %p3617_p13 = pneg %p3616_p11  ;;  %p3623_p2 = por %p3622_p12, %p3621_p4 }
 0x21d   : > { %p3624_p3 = pnand %p3623_p2, %p3617_p13 }
 0x21f   : > { %3627 = shalt.err (!%p3624_p3)
}
 0x220   : > { %s3628_s13 = scalar_lea.vmem %s850_s0, 16  ;;  %s3812_s28 = smov [#allocation26]  }
 0x221   : > { %p3629_p7 = scmp.ne.s32.totalorder %s850_s0, %s3628_s13  ;;  %s3633_s16 = sshll.u32 %s3812_s28, 4  ;;  %s3634_s16 = int_to_ptr.vmem [resolvable:$false] %s3633_s16 }
 0x222   : > { %s3635_s11 = scalar_lea.vmem %s3634_s16, 32  ;;  %p3636_p9 = scmp.lt.s32.totalorder %s850_s0, %s3634_s16 }
 0x223   : > { %p3631_p5 = pnand %p3629_p7, %p4932_p0  ;;  %p3637_p11 = scmp.lt.s32.totalorder %s3635_s11, %s3628_s13 }
 0x225   : > { %p3632_p8 = pneg %p3631_p5  ;;  %p3638_p10 = por %p3637_p11, %p3636_p9 }
 0x227   : > { %p3639_p1 = pnand %p3638_p10, %p3632_p8 }
 0x229   : > { %3642 = shalt.err (!%p3639_p1)
}
 0x22a   : > { %p4947_p6 = scmp.ne.s32.totalorder %s4911_s6, 0  ;;  %s4948_s18 = scalar_lea.sflag [#allocation25], %s4049_s24 }
 0x22b   : > { %s4949_s17 = sld [smem:[#allocation65_spill]]  ;;  %s876_s13 = scalar_lea.vmem [#allocation29], %s4056_s27 }
 0x22c   : > { %2978 = dma.hbm_to_vmem [thread:$0]  (!%p4947_p6), %s4470_s8, 16, %s850_s0, %s4948_s18  }
 0x22d   : > { %s883_s28 = sshll.u32 %s876_s13, 4  ;;  %s884_s28 = int_to_ptr.vmem [resolvable:$true] %s883_s28 }
 0x231   : > { %s4496_s26 = scalar_lea.hbm %s4949_s17, %s4121_s19  ;;  %s3648_s8 = scalar_lea.hbm %s4949_s17, 32 }
 0x232   : > { %s3643_s16 = scalar_lea.hbm %s4496_s26, 16  ;;  %p3649_p12 = scmp.lt.u32.totalorder %s4496_s26, %s4949_s17 }
 0x233   : > { %p3644_p10 = scmp.ne.s32.totalorder %s4496_s26, %s3643_s16  ;;  %p3650_p2 = scmp.lt.u32.totalorder %s3648_s8, %s3643_s16 }
 0x234   : > { %p3652_p7 = scmp.lt.u32.totalorder %s3643_s16, %s4496_s26 }
 0x235   : > { %p3646_p13 = pnand %p3644_p10, %p4932_p0  ;;  %p3651_p3 = por %p3650_p2, %p3649_p12 }
 0x237   : > { %p3647_p4 = pneg %p3646_p13  ;;  %p3653_p5 = por %p3652_p7, %p3651_p3 }
 0x239   : > { %p3654_p8 = pnand %p3653_p5, %p3647_p4 }
 0x23b   : > { %3657 = shalt.err (!%p3654_p8)
}
 0x23c   : > { %s3658_s19 = scalar_lea.vmem %s884_s28, 16  ;;  %s3813_s27 = smov [#allocation29]  }
 0x23d   : > { %p3659_p9 = scmp.ne.s32.totalorder %s884_s28, %s3658_s19  ;;  %s3663_s23 = sshll.u32 %s3813_s27, 4  ;;  %s3664_s23 = int_to_ptr.vmem [resolvable:$false] %s3663_s23 }
 0x23e   : > { %s3665_s3 = scalar_lea.vmem %s3664_s23, 32  ;;  %p3666_p10 = scmp.lt.s32.totalorder %s884_s28, %s3664_s23 }
 0x23f   : > { %p3661_p11 = pnand %p3659_p9, %p4932_p0  ;;  %p3667_p13 = scmp.lt.s32.totalorder %s3665_s3, %s3658_s19 }
 0x241   : > { %p3662_p1 = pneg %p3661_p11  ;;  %p3668_p6 = por %p3667_p13, %p3666_p10 }
 0x243   : > { %p3669_p2 = pnand %p3668_p6, %p3662_p1 }
 0x245   : > { %3672 = shalt.err (!%p3669_p2)
}
 0x246   : > { %p4950_p12 = scmp.ne.s32.totalorder %s4911_s6, 0  ;;  %s4951_s2 = scalar_lea.sflag [#allocation28], %s4049_s24 }
 0x247   : > { %s4952_s13 = sld [smem:[#allocation48_spill]] }
 0x248   : > { %2984 = dma.hbm_to_vmem [thread:$0]  (!%p4950_p12), %s4496_s26, 16, %s884_s28, %s4951_s2  }
 0x24d   : > { %p4953_p4 = scmp.ne.s32.totalorder %s4952_s13, 0 }
 0x24e   : > { %s4954_s21 = sld [smem:[#allocation46_spill]] (!%p4953_p4) }
 0x24f   : > { %892 = sbr.rel (%p4953_p4) target bundleno = 4144 (0x1030), region = 96 }
 0x254   : > { %p4955_p0 = scmp.eq.s32.totalorder (!%p4953_p4), %s4954_s21, 0 }
 0x256   : > { %3724 = dma.done.wait (%p4955_p0), [#allocation4], 128   ;;  %p4956_p3 = pmov %p4955_p0 }
 0x257   : > { %p4957_p7 = pmov %p4955_p0 }
 0x258   : > { %3726 = vsyncadd (%p4956_p3), [#allocation4], 4294967168 }
 0x259   : > { %3728 = dma.done.wait (%p4957_p7), [#allocation7], 160   ;;  %p4958_p6 = pmov %p4955_p0 }
 0x25a   : > { %p4959_p5 = pmov %p4955_p0 }
 0x25b   : > { %3730 = vsyncadd (%p4958_p6), [#allocation7], 4294967136 }
 0x25c   : > { %3732 = dma.done.wait (%p4959_p5), [#allocation10], 144   ;;  %p4960_p8 = pmov %p4955_p0 }
 0x25d   : > { %s4961_s24 = sld [smem:[#allocation47_spill]]  ;;  %s4533_s6 = sand.u32 1, %s4954_s21  }
 0x25e   : > { %3734 = vsyncadd (%p4960_p8), [#allocation10], 4294967152  ;;  %s4536_s26 = sand.u32 1, %s3773_s30   ;;  %s915_s16 = scalar_lea.sflag [#allocation13], %s4533_s6 }
 0x25f   : > { %s2868_s28 = smul.u32 48, %s4536_s26 }
 0x261   : > { %s4540_s11 = scalar_lea.vmem [#allocation12], %s2868_s28 }
 0x263   : > { %p4962_p9 = scmp.ne.s32.totalorder %s4961_s24, 0 }
 0x265   : > { %3736 = dma.done.wait (%p4962_p9), %s915_s16, 816  }
 0x266   : > { %3738 = vsyncadd (%p4962_p9), %s915_s16, 4294966480  ;;  %s2869_s8 = smul.u32 3, %s4536_s26  ;;  %s4548_s0 = sshll.u32 %s4536_s26, 4 }
 0x267   : > { %s933_s19 = scalar_lea.sflag [#allocation16], %s4533_s6  ;;  %s936_s27 = scalar_lea.vmem [#allocation15], %s4548_s0 }
 0x268   : > { %s4550_s18 = scalar_lea.vmem [#allocation14], %s2869_s8 }
 0x269   : > { %3740 = dma.done.wait (%p4962_p9), %s933_s19, 272  }
 0x26a   : > { %3742 = vsyncadd (%p4962_p9), %s933_s19, 4294967024  ;;  %s944_s23 = scalar_lea.vmem [#allocation17], %s4536_s26  ;;  %s950_s3 = scalar_lea.sflag [#allocation19], %s4533_s6 }
 0x26b   : > { %3744 = dma.done.wait (%p4962_p9), %s950_s3, 32  }
 0x26c   : > { %3746 = vsyncadd (%p4962_p9), %s950_s3, 4294967264  ;;  %s966_s28 = scalar_lea.sflag [#allocation22], %s4533_s6 }
 0x26d   : > { %3748 = dma.done.wait (%p4962_p9), %s966_s28, 272  }
 0x26e   : > { %3750 = vsyncadd (%p4962_p9), %s966_s28, 4294967024  ;;  %s977_s8 = scalar_lea.vmem [#allocation23], %s4536_s26  ;;  %s983_s19 = scalar_lea.sflag [#allocation25], %s4533_s6 }
 0x26f   : > { %s986_s2 = scalar_lea.vmem [#allocation24], %s4548_s0 }
 0x270   : > { %3752 = dma.done.wait (%p4962_p9), %s983_s19, 272  }
 0x271   : > { %3754 = vsyncadd (%p4962_p9), %s983_s19, 4294967024  ;;  %s994_s3 = scalar_lea.vmem [#allocation26], %s4536_s26  ;;  %s1000_s13 = scalar_lea.sflag [#allocation28], %s4533_s6 }
 0x272   : > { %s1002_s16 = scalar_lea.vmem [#allocation27], %s4536_s26 }
 0x273   : > { %3756 = dma.done.wait (%p4962_p9), %s1000_s13, 32  }
 0x274   : > { %3758 = vsyncadd (%p4962_p9), %s1000_s13, 4294967264  ;;  %s1010_s28 = scalar_lea.vmem [#allocation29], %s4536_s26  ;;  %p4963_p11 = pmov %p4955_p0 }
 0x275   : > { %p4964_p1 = pmov %p4955_p0 }
 0x276   : > { %3760 = dma.done.wait (%p4963_p11), [#allocation31], 32  }
 0x277   : > { %3762 = vsyncadd (%p4964_p1), [#allocation31], 4294967264  ;;  %s4965_s19 = sld [smem:[#allocation45_spill]] }
 0x27d   : > { %p2653_p10 = scmp.ne.s32.totalorder %s4965_s19, 0 }
 0x27e   : > { %v3070_v0 = vld [vmem:[#allocation9] sm:$0xff] (!%p2653_p10)   ;;  %v3814_v1 = vmov (!%p2653_p10), 0.0   ;;  %v3071_v2 = vld [vmem:[#allocation3] sm:$0xff] (!%p2653_p10)   ;;  %vm3815_vm0 = vmmov (!%p2653_p10), 0   ;;  %vm1146_vm1 = vcmask (!%p2653_p10), 130048   ;;  %v1191_v5 = vld [vmem:[#allocation8] sm:$0xff] (!%p2653_p10) }
 0x27f   : > { %1123 = sbr.rel (%p2653_p10) target bundleno = 862 (0x35e), region = 176  ;;  %2762 = vmatprep.subr.bf16.mxu0 (!%p2653_p10), %v3814_v1  ;;  %2764 = vmatprep.mubr.msk.bf16.mxu0 (!%p2653_p10), %vm3815_vm0, %v3814_v1  ;;  %v2654_v3 = vld [vmem:[#allocation11] ss:$0 sm:$0xff] (!%p2653_p10)  ;;  %vm1194_vm2 = vcmask (!%p2653_p10), 261120  }
 0x280   : > { %2763 = vmatpush3.bf16.msra.mxu0 (!%p2653_p10), %v3070_v0 }
 0x283   : > { %2765 = vmatmul.mubr.msk.bf16.vlgmr.msra.gmra.mrb[0].mxu0 (!%p2653_p10), %vm1146_vm1, %v3071_v2 }
 0x356   : > { %v1184_v4 = vpop.f32.mrb[0].mxu0 }
 0x357   : > { %v1185_v6 = vadd.f32 %v2654_v3, %v1184_v4  ;;  %v2766_v7 = vpop.f32.mrb[1].mxu0 }
 0x358   : > { %v1187_v8 = vpop.f32.mrb[2].mxu0 }
 0x359   : > { %v1192_v9 = vadd.f32 %v1191_v5, %v1185_v6  ;;  %v1188_v10 = vadd.f32 %v2654_v3, %v1187_v8  ;;  %v2767_v11 = vpop.f32.mrb[3].mxu0 }
 0x35b   : > { %1195 = vst.msk [vmem:[#allocation2] sm:$0xff] %vm1194_vm2, %v1192_v9  ;;  %v1193_v12 = vadd.f32 %v1191_v5, %v1188_v10 }
 0x35d   : > { %1196 = vst.msk [vmem:[#allocation2 + $0x8] sm:$0xff] %vm1194_vm2, %v1193_v12 }
 0x35e PF: > { %v3077_v13 = vld [vmem:[%s4540_s11 + $0x10] sm:$0xff]   ;;  %v3816_v14 = vmov 0.0   ;;  %v3078_v15 = vld [vmem:[%s4540_s11] sm:$0xff]   ;;  %v3079_v16 = vld [vmem:[%s4540_s11 + $0x18] sm:$0xff]   ;;  %vm3817_vm3 = vmmov 0   ;;  %vm1227_vm4 = vcmask 261120   ;;  %v1519_v56 = vlaneseq }
 0x35f   : > { %2776 = vmatprep.subr.bf16.mxu1 %v3816_v14  ;;  %2768 = vmatprep.subr.bf16.mxu0 %v3816_v14  ;;  %v3080_v19 = vld [vmem:[%s4540_s11 + $0x8] sm:$0xff]   ;;  %v3081_v21 = vld [vmem:[%s4540_s11 + $0x20] sm:$0xff]   ;;  %vm1424_vm5 = vcmask 130048   ;;  %s3818_s21 = smov 112   ;;  %vm1559_vm6 = vcmask 1043456   ;;  %v3819_v61 = vmov 0  }
 0x360   : > { %2777 = vmatpush3.bf16.msra.mxu1 %v3077_v13  ;;  %2780 = vmatprep.mubr.msk.bf16.mxu1 %vm3817_vm3, %v3816_v14  ;;  %v3082_v22 = vld [vmem:[%s4540_s11 + $0x28] sm:$0xff]   ;;  %v2667_v23 = vld [vmem:[%s4550_s18 + $0x1] ss:$0 sm:$0xff]  ;;  %v2658_v24 = vld [vmem:[%s4550_s18] ss:$0 sm:$0xff]  ;;  %v1520_v58 = vshrl.u32 %v1519_v56, 7 }
 0x361   : > { %2778 = vmatprep.subr.bf16.mxu1 %v3816_v14  ;;  %2769 = vmatpush3.bf16.msra.mxu0 %v3078_v15  ;;  %v2676_v42 = vld [vmem:[%s4550_s18 + $0x2] ss:$0 sm:$0xff]  ;;  %v1197_v57 = vld [vmem:[#allocation6] sm:$0x1]  ;;  %v1198_v59 = vld [vmem:[#allocation6 + $0x1] sm:$0x1] }
 0x362   : > { %v4600_v17 = vld [vmem:[#allocation2] sm:$0xff]  ;;  %2770 = vmatprep.subr.bf16.mxu0 %v3816_v14  ;;  %2772 = vmatprep.mubr.msk.bf16.mxu0 %vm3817_vm3, %v3816_v14  ;;  %vm1199_vm7 = vcmp.eq.s32.totalorder %v1197_v57, 0  ;;  %v1521_v60 = vsub.s32 0, %v1520_v58  ;;  %vm1200_vm8 = vcmp.eq.s32.totalorder %v1198_v59, 0  ;;  %vm1531_vm10 = vcmask 64512   ;;  %s3820_s24 = smov 16  }
 0x363   : > { %v1517_v62 = vsel %vm1199_vm7, 1, %v3819_v61  ;;  %v1518_v63 = vsel %vm1200_vm8, 1, %v3819_v61  ;;  %s4966_s6 = scalar_lea.vmem [#allocation21], %s4548_s0  ;;  %s4968_s18 = scalar_lea.vmem [#allocation18], %s4536_s26 }
 0x364   : > { %v4602_v18 = vld [vmem:[#allocation2 + $0x8] sm:$0xff]  ;;  %2779 = vmatpush3.bf16.msra.mxu1 %v3079_v16  ;;  %v4655_v0 = vrot.slane %v1517_v62, %v1521_v60  ;;  %v4657_v1 = vrot.slane %v1518_v63, %v1521_v60  ;;  %s4967_s11 = smov %s4966_s6  ;;  %s4970_s0 = sld [smem:[#allocation45_spill]] }
 0x365   : > { %v1203_v20 = vpack.c.bf16 %v4602_v18, %v4600_v17  ;;  %2771 = vmatpush3.bf16.msra.mxu0 %v3080_v19  ;;  %2792 = vmatprep.subr.bf16.mxu1 %v3816_v14 }
 0x366   : > { %2784 = vmatprep.subr.bf16.mxu0 %v3816_v14  ;;  %vm1527_vm9 = vcmp.eq.s32.totalorder %v4655_v0, 1  ;;  %vm1528_vm11 = vcmp.eq.s32.totalorder %v4657_v1, 1 }
 0x367   : > { %2781 = vmatmul.mubr.msk.bf16.vlgmr.msra.gmra.mrb[0].mxu1 %vm1227_vm4, %v1203_v20 }
 0x368   : > { %2773 = vmatmul.mubr.msk.bf16.vlgmr.msra.gmra.mrb[0].mxu0 %vm1227_vm4, %v1203_v20  ;;  %2794 = vmatprep.mubr.msk.bf16.mxu1 %vm3817_vm3, %v3816_v14 }
 0x369   : > { %2785 = vmatpush3.bf16.msra.mxu0 %v3081_v21  ;;  %2788 = vmatprep.mubr.msk.bf16.mxu0 %vm3817_vm3, %v3816_v14 }
 0x36a   : > { %2786 = vmatprep.subr.bf16.mxu0 %v3816_v14  ;;  %p2710_p13 = scmp.ne.s32.totalorder %s4970_s0, 1 }
 0x36b   : > { %vm2197_vm12 = vcmask (!%p2710_p13), 253952   ;;  %vm2193_vm13 = vcmask (!%p2710_p13), 261127  }
 0x36d   : > { %2787 = vmatpush3.bf16.msra.mxu0 %v3082_v22 }
 0x36e   : > { %2798 = vmatprep.subr.bf16.mxu0 %v3816_v14 }
 0x370   : > { %2789 = vmatmul.mubr.msk.bf16.vlgmr.msra.gmra.mrb[4].mxu0 %vm1227_vm4, %v1203_v20 }
 0x371   : > { %2800 = vmatprep.mubr.msk.bf16.mxu0 %vm3817_vm3, %v3816_v14 }
 0x43a   : > { %v1331_v25 = vpop.f32.mrb[0].mxu1 }
 0x43b   : > { %v1332_v26 = vadd.f32 %v2667_v23, %v1331_v25  ;;  %v2782_v27 = vpop.f32.mrb[1].mxu1  ;;  %v1265_v28 = vpop.f32.mrb[0].mxu0 }
 0x43c   : > { %v1334_v29 = vpop.f32.mrb[2].mxu1  ;;  %v1266_v30 = vadd.f32 %v2658_v24, %v1265_v28  ;;  %v2774_v31 = vpop.f32.mrb[1].mxu0 }
 0x43d   : > { %v4627_v32 = vpack.c.bf16 %v1332_v26, %v1332_v26  ;;  %v1335_v33 = vadd.f32 %v2667_v23, %v1334_v29  ;;  %v2783_v34 = vpop.f32.mrb[3].mxu1  ;;  %v1268_v35 = vpop.f32.mrb[2].mxu0 }
 0x43e   : > { %v2775_v36 = vpop.f32.mrb[3].mxu0  ;;  %v1404_v39 = vmul.f32 0.25, %v1266_v30  ;;  %v1269_v40 = vadd.f32 %v2658_v24, %v1268_v35 }
 0x43f   : > { %v1429_v37 = vsel %vm1424_vm5, %v4627_v32, 0  ;;  %v2723_v38 = vpack.c.bf16 %v1335_v33, %v1335_v33 }
 0x440   : > { %2793 = vmatpush3.bf16.xpose.msra.mxu1 %v1429_v37  ;;  %v4635_v43 = vpack.c.bf16 %v1404_v39, %v1404_v39  ;;  %v1405_v44 = vmul.f32 0.25, %v1269_v40 }
 0x441   : > { %v1475_v41 = vsel %vm1424_vm5, %v2723_v38, 0  ;;  %1701 = vrot.lane.b32.xlu1 %v2723_v38, %s3818_s21  ;;  %2804 = vmatprep.subr.bf16.mxu1 %v3816_v14 }
 0x442   : > { %2799 = vmatpush3.bf16.xpose.msra.mxu0 %v1475_v41  ;;  %v2721_v52 = vpack.c.bf16 %v1405_v44, %v1405_v44 }
 0x443   : > { %v1397_v45 = vpop.f32.mrb[4].mxu0  ;;  %2810 = vmatprep.subr.bf16.mxu0 %v3816_v14 }
 0x444   : > { %v1398_v46 = vadd.f32 %v2676_v42, %v1397_v45  ;;  %v2790_v47 = vpop.f32.mrb[5].mxu0 }
 0x445   : > { %v1400_v48 = vpop.f32.mrb[6].mxu0 }
 0x446   : > { %v4638_v49 = vpack.c.bf16 %v1398_v46, %v1398_v46  ;;  %v1401_v50 = vadd.f32 %v2676_v42, %v1400_v48  ;;  %v2791_v51 = vpop.f32.mrb[7].mxu0 }
 0x447   : > { %2795 = vmatmul.mubr.msk.bf16.vlgmr.msra.gmra.mrb[4].mxu1 %vm1424_vm5, %v4635_v43 }
 0x448   : > { %v1561_v53 = vsel %vm1559_vm6, %v4638_v49, 0  ;;  %v4644_v54 = vpack.c.bf16 %v1401_v50, %v1401_v50  ;;  %2806 = vmatprep.mubr.msk.bf16.mxu1 %vm3817_vm3, %v3816_v14 }
 0x449   : > { %2801 = vmatmul.mubr.msk.bf16.vlgmr.msra.gmra.mrb[8].mxu0 %vm1424_vm5, %v2721_v52  ;;  %2805 = vmatpush3.bf16.msra.mxu1 %v1561_v53 }
 0x44a   : > { %v1607_v55 = vsel %vm1559_vm6, %v4644_v54, 0  ;;  %2816 = vmatprep.subr.bf16.mxu1 %v3816_v14  ;;  %2812 = vmatprep.mubr.msk.bf16.mxu0 %vm3817_vm3, %v3816_v14 }
 0x44b   : > { %2811 = vmatpush3.bf16.msra.mxu0 %v1607_v55 }
 0x44c   : > { %2822 = vmatprep.subr.bf16.mxu0 %v3816_v14 }
 0x4b3   : > { %v1702_v27 = vpop.permute.xlu1 %1701 }
 0x4b4   : > { %v1707_v38 = vsel %vm1424_vm5, %v1702_v27, 0 }
 0x51a   : > { %v1465_v2 = vpop.f32.mrb[4].mxu1 }
 0x51b   : > { %v1529_v3 = vsel %vm1527_vm9, -1e+09, %v1465_v2  ;;  %v2796_v4 = vpop.f32.mrb[5].mxu1 }
 0x51c   : > { %v1468_v5 = vpop.f32.mrb[6].mxu1  ;;  %v1511_v6 = vpop.f32.mrb[8].mxu0  ;;  %v1532_v7 = vsel %vm1531_vm10, %v1529_v3, -inf }
 0x51d   : > { %v1530_v8 = vsel %vm1528_vm11, -1e+09, %v1511_v6  ;;  %v2797_v9 = vpop.f32.mrb[7].mxu1  ;;  %v2802_v10 = vpop.f32.mrb[9].mxu0  ;;  %1533 = vmax.xlane.f32.xlu0 %v1532_v7 }
 0x51e   : > { %v1514_v11 = vpop.f32.mrb[10].mxu0  ;;  %v1535_v13 = vsel %vm1531_vm10, %v1530_v8, -inf }
 0x51f   : > { %v2803_v12 = vpop.f32.mrb[11].mxu0 }
 0x521   : > { %1536 = vmax.xlane.f32.xlu0 %v1535_v13 }
 0x537   : > { %1651 = vrot.lane.b32.xlu0 %v4627_v32, %s3818_s21 }
 0x5aa   : > { %v1534_v15 = vpop.xlane.xlu0 %1533 }
 0x5ab   : > { %v1538_v16 = vsub.f32 %v1529_v3, %v1534_v15 }
 0x5ad   : > { %v1540_v19 = vmul.f32 1.442695, %v1538_v16 }
 0x5ae   : > { %v1537_v20 = vpop.xlane.xlu0 %1536 }
 0x5af   : > { %3089 = vpow2.f32 %v1540_v19  ;;  %v1539_v21 = vsub.f32 %v1530_v8, %v1537_v20 }
 0x5b1   : > { %v1542_v22 = vmul.f32 1.442695, %v1539_v21 }
 0x5b2   : > { %v1652_v32 = vpop.permute.xlu0 %1651 }
 0x5b3   : > { %3091 = vpow2.f32 %v1542_v22  ;;  %v1657_v35 = vsel %vm1424_vm5, %v1652_v32, 0  ;;  %v3083_v22 = vld [vmem:[%s936_s27] sm:$0xff]  }
 0x5b9   : > { %v3090_v23 = vpop.eup %3089 }
 0x5ba   : > { %v1544_v24 = vsel %vm1531_vm10, %v3090_v23, 0.0 }
 0x5bb   : > { %1545 = vadd.xlane.f32.xlu1 %v1544_v24 }
 0x5bd   : > { %v3092_v25 = vpop.eup %3091 }
 0x5be   : > { %v1547_v26 = vsel %vm1531_vm10, %v3092_v25, 0.0 }
 0x5bf   : > { %1548 = vadd.xlane.f32.xlu1 %v1547_v26 }
 0x5d0   : > { %1649 = vrot.lane.b32.xlu1 %v4635_v43, %s3818_s21 }
 0x5d4   : > { %1699 = vrot.lane.b32.xlu1 %v2721_v52, %s3818_s21 }
 0x648   : > { %v1546_v28 = vpop.xlane.xlu1 %1545 }
 0x649   : > { %3093 = vrcp.f32 %v1546_v28 }
 0x64c   : > { %v1549_v29 = vpop.xlane.xlu1 %1548 }
 0x64d   : > { %3095 = vrcp.f32 %v1549_v29 }
 0x650   : > { %v1650_v39 = vpop.permute.xlu1 %1649 }
 0x653   : > { %v3094_v30 = vpop.eup %3093 }
 0x654   : > { %v1552_v31 = vmul.f32 %v3094_v30, %v3090_v23  ;;  %v1700_v40 = vpop.permute.xlu1 %1699  ;;  %v3084_v23 = vld [vmem:[%s936_s27 + $0x8] sm:$0xff]   ;;  %s4969_s27 = scalar_lea.vmem [#allocation20], %s4536_s26 }
 0x656   : > { %v1554_v33 = vpack.c.bf16 %v1552_v31, %v1552_v31 }
 0x657   : > { %v3096_v34 = vpop.eup %3095 }
 0x658   : > { %v1553_v36 = vmul.f32 %v3096_v34, %v3092_v25  ;;  %2807 = vmatmul.mubr.msk.bf16.vlgmr.msra.gmra.mrb[8].mxu1 %vm1531_vm10, %v1554_v33 }
 0x659   : > { %2817 = vmatpush3.bf16.xpose.msra.mxu1 %v1657_v35  ;;  %2818 = vmatprep.mubr.msk.bf16.mxu1 %vm3817_vm3, %v3816_v14 }
 0x65a   : > { %v1555_v37 = vpack.c.bf16 %v1553_v36, %v1553_v36  ;;  %2828 = vmatprep.subr.bf16.mxu1 %v3816_v14 }
 0x65c   : > { %2813 = vmatmul.mubr.msk.bf16.vlgmr.msra.gmra.mrb[12].mxu0 %vm1531_vm10, %v1555_v37 }
 0x65d   : > { %2823 = vmatpush3.bf16.xpose.msra.mxu0 %v1707_v38  ;;  %2824 = vmatprep.mubr.msk.bf16.mxu0 %vm3817_vm3, %v3816_v14 }
 0x65e   : > { %2834 = vmatprep.subr.bf16.mxu0 %v3816_v14 }
 0x660   : > { %2819 = vmatmul.mubr.msk.bf16.vlgmr.msra.gmra.mrb[12].mxu1 %vm1424_vm5, %v1650_v39  ;;  %v2694_v39 = vld [vmem:[%s944_s23] ss:$0 sm:$0xff] }
 0x661   : > { %2830 = vmatprep.mubr.msk.bf16.mxu1 %vm3817_vm3, %v3816_v14 }
 0x664   : > { %2825 = vmatmul.mubr.msk.bf16.vlgmr.msra.gmra.mrb[16].mxu0 %vm1424_vm5, %v1700_v40 }
 0x665   : > { %2836 = vmatprep.mubr.msk.bf16.mxu0 %vm3817_vm3, %v3816_v14 }
 0x72b   : > { %v4690_v41 = vpop.f32.mrb[8].mxu1 }
 0x72c   : > { %v2808_v42 = vpop.f32.mrb[9].mxu1 }
 0x72d   : > { %v1600_v43 = vpop.f32.mrb[10].mxu1 }
 0x72e   : > { %v2809_v44 = vpop.f32.mrb[11].mxu1 }
 0x72f   : > { %v4692_v45 = vpop.f32.mrb[12].mxu0 }
 0x730   : > { %v2814_v46 = vpop.f32.mrb[13].mxu0 }
 0x731   : > { %v1646_v47 = vpop.f32.mrb[14].mxu0 }
 0x732   : > { %v2815_v48 = vpop.f32.mrb[15].mxu0 }
 0x733   : > { %v1693_v50 = vpop.f32.mrb[12].mxu1 }
 0x734   : > { %v1749_v51 = vsel %vm1527_vm9, -1e+09, %v1693_v50  ;;  %v2820_v52 = vpop.f32.mrb[13].mxu1 }
 0x735   : > { %v1696_v53 = vpop.f32.mrb[14].mxu1  ;;  %v1751_v55 = vsel %vm1531_vm10, %v1749_v51, -inf }
 0x736   : > { %1752 = vmax.xlane.f32.xlu0 %v1751_v55  ;;  %v2821_v56 = vpop.f32.mrb[15].mxu1 }
 0x737   : > { %v1743_v57 = vpop.f32.mrb[16].mxu0 }
 0x738   : > { %v1750_v58 = vsel %vm1528_vm11, -1e+09, %v1743_v57  ;;  %v2826_v59 = vpop.f32.mrb[17].mxu0 }
 0x739   : > { %v1746_v60 = vpop.f32.mrb[18].mxu0  ;;  %v1754_v61 = vsel %vm1531_vm10, %v1750_v58, -inf }
 0x73a   : > { %1755 = vmax.xlane.f32.xlu1 %v1754_v61  ;;  %v2827_v62 = vpop.f32.mrb[19].mxu0  ;;  %v3086_v61 = vld [vmem:[%s4967_s11 + $0x8] sm:$0xff]  }
 0x74b   : > { %1823 = vrot.lane.b32.xlu1 %v4644_v54, %s3818_s21 }
 0x7c3   : > { %v1753_v63 = vpop.xlane.xlu0 %1752 }
 0x7c4   : > { %v1757_v0 = vsub.f32 %v1749_v51, %v1753_v63 }
 0x7c6   : > { %v1759_v2 = vmul.f32 1.442695, %v1757_v0 }
 0x7c7   : > { %v1756_v3 = vpop.xlane.xlu1 %1755 }
 0x7c8   : > { %3097 = vpow2.f32 %v1759_v2  ;;  %v1758_v4 = vsub.f32 %v1750_v58, %v1756_v3 }
 0x7ca   : > { %v1761_v5 = vmul.f32 1.442695, %v1758_v4 }
 0x7cb   : > { %v1824_v6 = vpop.permute.xlu1 %1823 }
 0x7cc   : > { %3099 = vpow2.f32 %v1761_v5  ;;  %v1829_v1 = vsel %vm1559_vm6, %v1824_v6, 0 }
 0x7cd   : > { %2835 = vmatpush3.bf16.msra.mxu0 %v1829_v1  ;;  %v2698_v1 = vld [vmem:[%s4968_s18] ss:$0 sm:$0xff] }
 0x7ce   : > { %2848 = vmatprep.subr.bf16.mxu0 %v3816_v14 }
 0x7d2   : > { %v3098_v7 = vpop.eup %3097 }
 0x7d3   : > { %v1763_v8 = vsel %vm1531_vm10, %v3098_v7, 0.0 }
 0x7d4   : > { %1764 = vadd.xlane.f32.xlu0 %v1763_v8 }
 0x7d6   : > { %v3100_v9 = vpop.eup %3099 }
 0x7d7   : > { %v1766_v54 = vsel %vm1531_vm10, %v3100_v9, 0.0 }
 0x7d8   : > { %1767 = vadd.xlane.f32.xlu0 %v1766_v54  ;;  %v2699_v54 = vld [vmem:[%s4969_s27] ss:$0 sm:$0xff] }
 0x7ee   : > { %1775 = vrot.lane.b32.xlu0 %v4638_v49, %s3818_s21 }
 0x861   : > { %v1765_v10 = vpop.xlane.xlu0 %1764 }
 0x862   : > { %3101 = vrcp.f32 %v1765_v10 }
 0x865   : > { %v1768_v11 = vpop.xlane.xlu0 %1767 }
 0x866   : > { %3103 = vrcp.f32 %v1768_v11 }
 0x869   : > { %v1776_v12 = vpop.permute.xlu0 %1775 }
 0x86a   : > { %v1781_v13 = vsel %vm1559_vm6, %v1776_v12, 0 }
 0x86b   : > { %2829 = vmatpush3.bf16.msra.mxu1 %v1781_v13 }
 0x86c   : > { %v3102_v15 = vpop.eup %3101  ;;  %2840 = vmatprep.subr.bf16.mxu1 %v3816_v14 }
 0x86d   : > { %v1771_v16 = vmul.f32 %v3102_v15, %v3098_v7  ;;  %v3087_v15 = vld [vmem:[%s986_s2] sm:$0xff]  }
 0x86f   : > { %v1773_v19 = vpack.c.bf16 %v1771_v16, %v1771_v16  ;;  %v3088_v16 = vld [vmem:[%s986_s2 + $0x8] sm:$0xff]  }
 0x870   : > { %v3104_v20 = vpop.eup %3103 }
 0x871   : > { %v1772_v21 = vmul.f32 %v3104_v20, %v3100_v9  ;;  %2831 = vmatmul.mubr.msk.bf16.vlgmr.msra.gmra.mrb[16].mxu1 %vm1531_vm10, %v1773_v19  ;;  %v2700_v19 = vld [vmem:[%s977_s8] ss:$0 sm:$0xff] }
 0x872   : > { %2844 = vmatprep.mubr.msk.bf16.mxu1 %vm3817_vm3, %v3816_v14  ;;  %2841 = vmatpush3.bf16.msra.mxu1 %v3083_v22 }
 0x873   : > { %v1774_v49 = vpack.c.bf16 %v1772_v21, %v1772_v21  ;;  %2842 = vmatprep.subr.bf16.mxu1 %v3816_v14 }
 0x875   : > { %2837 = vmatmul.mubr.msk.bf16.vlgmr.msra.gmra.mrb[20].mxu0 %vm1531_vm10, %v1774_v49 }
 0x876   : > { %2852 = vmatprep.mubr.msk.bf16.mxu0 %vm3817_vm3, %v3816_v14  ;;  %2843 = vmatpush3.bf16.msra.mxu1 %v3084_v23 }
 0x877   : > { %2856 = vmatprep.subr.bf16.mxu1 %v3816_v14 }
 0x944   : > { %v1817_v24 = vpop.f32.mrb[16].mxu1 }
 0x945   : > { %v2832_v25 = vpop.f32.mrb[17].mxu1 }
 0x946   : > { %v1820_v26 = vpop.f32.mrb[18].mxu1 }
 0x947   : > { %v2833_v27 = vpop.f32.mrb[19].mxu1 }
 0x948   : > { %v1865_v28 = vpop.f32.mrb[20].mxu0 }
 0x949   : > { %v3072_v29 = vpack.i.bf16 %v1865_v28, %v1817_v24  ;;  %v2838_v30 = vpop.f32.mrb[21].mxu0  ;;  %v2704_v28 = vld [vmem:[%s994_s3] ss:$0 sm:$0xff] }
 0x94a   : > { %v1868_v31 = vpop.f32.mrb[22].mxu0 }
 0x94b   : > { %v2839_v32 = vpop.f32.mrb[23].mxu0  ;;  %3073 = vrot.lane.b32.xlu1 %v3072_v29, %s3820_s24 }
 0x9bd   : > { %v3074_v33 = vpop.permute.xlu1 %3073 }
 0x9be   : > { %v3076_v34 = vunpack.i.h.bf16 %v3074_v33  ;;  %v3075_v35 = vunpack.i.l.bf16 %v3074_v33 }
 0x9c0   : > { %v1880_v36 = vsel %vm1424_vm5, %v4692_v45, %v3076_v34  ;;  %v1879_v37 = vsel %vm1424_vm5, %v4690_v41, %v3075_v35 }
 0x9c1   : > { %v1881_v38 = vpack.c.bf16 %v1880_v36, %v1879_v37 }
 0x9c3   : > { %2845 = vmatmul.mubr.msk.bf16.vlgmr.msra.gmra.mrb[20].mxu1 %vm1227_vm4, %v1881_v38 }
 0x9c4   : > { %2860 = vmatprep.mubr.msk.bf16.mxu1 %vm3817_vm3, %v3816_v14  ;;  %2857 = vmatpush3.bf16.msra.mxu1 %v3087_v15 }
 0x9c5   : > { %2858 = vmatprep.subr.bf16.mxu1 %v3816_v14 }
 0x9c8   : > { %2859 = vmatpush3.bf16.msra.mxu1 %v3088_v16 }
 0xa96   : > { %v1942_v40 = vpop.f32.mrb[20].mxu1 }
 0xa97   : > { %v1943_v42 = vadd.f32 %v2694_v39, %v1942_v40  ;;  %v2846_v43 = vpop.f32.mrb[21].mxu1 }
 0xa98   : > { %v1945_v44 = vpop.f32.mrb[22].mxu1 }
 0xa99   : > { %v1946_v46 = vadd.f32 %v2694_v39, %v1945_v44  ;;  %v2847_v47 = vpop.f32.mrb[23].mxu1  ;;  %v1949_v48 = vadd.f32 %v1943_v42, %v4600_v17 }
 0xa9b   : > { %v1953_v45 = vsel %vm1227_vm4, %v1949_v48, 0.0  ;;  %v1950_v41 = vadd.f32 %v1946_v46, %v4602_v18  ;;  %v3085_v18 = vld [vmem:[%s4966_s6] sm:$0xff]  }
 0xa9c   : > { %1954 = vadd.xlane.f32.xlu1 %v1953_v45  ;;  %2849 = vmatpush3.bf16.msra.mxu0 %v3085_v18 }
 0xa9d   : > { %v1956_v50 = vsel %vm1227_vm4, %v1950_v41, 0.0  ;;  %2850 = vmatprep.subr.bf16.mxu0 %v3816_v14 }
 0xa9e   : > { %1957 = vadd.xlane.f32.xlu0 %v1956_v50 }
 0xaa0   : > { %2851 = vmatpush3.bf16.msra.mxu0 %v3086_v61 }
 0xb29   : > { %v1955_v51 = vpop.xlane.xlu1 %1954 }
 0xb2a   : > { %v1960_v52 = vmul.f32 0.03125, %v1955_v51 }
 0xb2b   : > { %v1958_v53 = vpop.xlane.xlu0 %1957 }
 0xb2c   : > { %v1962_v55 = vsub.f32 %v1949_v48, %v1960_v52  ;;  %v1961_v56 = vmul.f32 0.03125, %v1958_v53 }
 0xb2e   : > { %v1963_v57 = vsub.f32 %v1950_v41, %v1961_v56  ;;  %v1964_v58 = vmul.f32 %v1962_v55, %v1962_v55 }
 0xb30   : > { %v1966_v59 = vsel %vm1227_vm4, %v1964_v58, 0.0  ;;  %v1965_v17 = vmul.f32 %v1963_v57, %v1963_v57 }
 0xb31   : > { %1967 = vadd.xlane.f32.xlu0 %v1966_v59 }
 0xb32   : > { %v1969_v60 = vsel %vm1227_vm4, %v1965_v17, 0.0  ;;  %v2709_v17 = vld [vmem:[%s1010_s28] ss:$0 sm:$0xff] }
 0xb35   : > { %1970 = vadd.xlane.f32.xlu0 %v1969_v60 }
 0xbbe   : > { %v1968_v62 = vpop.xlane.xlu0 %1967 }
 0xbbf   : > { %v1972_v63 = vmul.f32 0.03125, %v1968_v62 }
 0xbc1   : > { %v1974_v0 = vadd.f32 1e-05, %v1972_v63 }
 0xbc2   : > { %v1971_v2 = vpop.xlane.xlu0 %1970 }
 0xbc3   : > { %3105 = vrsqrt.f32 %v1974_v0  ;;  %v1973_v3 = vmul.f32 0.03125, %v1971_v2 }
 0xbc5   : > { %v1975_v4 = vadd.f32 1e-05, %v1973_v3 }
 0xbc7   : > { %3107 = vrsqrt.f32 %v1975_v4 }
 0xbcd   : > { %v3106_v5 = vpop.eup %3105 }
 0xbce   : > { %v1978_v6 = vmul.f32 %v3106_v5, %v1962_v55 }
 0xbd0   : > { %v1986_v8 = vmul.f32 %v2698_v1, %v1978_v6 }
 0xbd1   : > { %v3108_v7 = vpop.eup %3107 }
 0xbd2   : > { %v1979_v9 = vmul.f32 %v3108_v7, %v1963_v57  ;;  %v1994_v11 = vadd.f32 %v2699_v54, %v1986_v8  ;;  %v2708_v57 = vld [vmem:[%s1002_s16] ss:$0 sm:$0xff] }
 0xbd4   : > { %v1987_v10 = vmul.f32 %v2698_v1, %v1979_v9 }
 0xbd6   : > { %v1995_v12 = vadd.f32 %v2699_v54, %v1987_v10 }
 0xbd8   : > { %v1996_v13 = vpack.c.bf16 %v1995_v12, %v1994_v11 }
 0xbda   : > { %2853 = vmatmul.mubr.msk.bf16.vlgmr.msra.gmra.mrb[24].mxu0 %vm1227_vm4, %v1996_v13 }
 0xcad   : > { %v2057_v20 = vpop.f32.mrb[24].mxu0 }
 0xcae   : > { %v2058_v21 = vadd.f32 %v2700_v19, %v2057_v20  ;;  %v2854_v49 = vpop.f32.mrb[25].mxu0 }
 0xcaf   : > { %v2060_v22 = vpop.f32.mrb[26].mxu0 }
 0xcb0   : > { %v2061_v23 = vadd.f32 %v2700_v19, %v2060_v22  ;;  %v2855_v24 = vpop.f32.mrb[27].mxu0  ;;  %v2064_v25 = vmax.f32 %v2058_v21, 0.0 }
 0xcb1   : > { %v2711_v24 = vld [vmem:[#allocation30] ss:$0 sm:$0xff] (!%p2710_p13) }
 0xcb2   : > { %v2065_v26 = vmax.f32 %v2061_v23, 0.0 }
 0xcb4   : > { %v2066_v27 = vpack.c.bf16 %v2065_v26, %v2064_v25 }
 0xcb6   : > { %2861 = vmatmul.mubr.msk.bf16.vlgmr.msra.gmra.mrb[24].mxu1 %vm1227_vm4, %v2066_v27  ;;  %v2712_v27 = vld [vmem:[#allocation32] ss:$0 sm:$0xff] (!%p2710_p13) }
 0xd89   : > { %v2127_v29 = vpop.f32.mrb[24].mxu1 }
 0xd8a   : > { %v2128_v14 = vadd.f32 %v2704_v28, %v2127_v29  ;;  %v2862_v30 = vpop.f32.mrb[25].mxu1 }
 0xd8b   : > { %v2130_v31 = vpop.f32.mrb[26].mxu1 }
 0xd8c   : > { %v2131_v32 = vadd.f32 %v2704_v28, %v2130_v31  ;;  %v2863_v33 = vpop.f32.mrb[27].mxu1  ;;  %v2134_v34 = vadd.f32 %v2128_v14, %v1994_v11 }
 0xd8e   : > { %v2138_v35 = vsel %vm1227_vm4, %v2134_v34, 0.0  ;;  %v2135_v36 = vadd.f32 %v2131_v32, %v1995_v12 }
 0xd8f   : > { %2139 = vadd.xlane.f32.xlu1 %v2138_v35 }
 0xd90   : > { %v2141_v37 = vsel %vm1227_vm4, %v2135_v36, 0.0 }
 0xd91   : > { %2142 = vadd.xlane.f32.xlu0 %v2141_v37 }
 0xe1c   : > { %v2140_v38 = vpop.xlane.xlu1 %2139 }
 0xe1d   : > { %v2144_v39 = vmul.f32 0.03125, %v2140_v38 }
 0xe1e   : > { %v2143_v40 = vpop.xlane.xlu0 %2142 }
 0xe1f   : > { %v2146_v42 = vsub.f32 %v2134_v34, %v2144_v39  ;;  %v2145_v43 = vmul.f32 0.03125, %v2143_v40 }
 0xe21   : > { %v2147_v44 = vsub.f32 %v2135_v36, %v2145_v43  ;;  %v2148_v46 = vmul.f32 %v2146_v42, %v2146_v42 }
 0xe23   : > { %v2150_v47 = vsel %vm1227_vm4, %v2148_v46, 0.0  ;;  %v2149_v48 = vmul.f32 %v2147_v44, %v2147_v44 }
 0xe24   : > { %2151 = vadd.xlane.f32.xlu1 %v2150_v47 }
 0xe25   : > { %v2153_v45 = vsel %vm1227_vm4, %v2149_v48, 0.0 }
 0xe26   : > { %2154 = vadd.xlane.f32.xlu0 %v2153_v45 }
 0xeb1   : > { %v2152_v41 = vpop.xlane.xlu1 %2151 }
 0xeb2   : > { %v2156_v50 = vmul.f32 0.03125, %v2152_v41 }
 0xeb3   : > { %v2155_v51 = vpop.xlane.xlu0 %2154 }
 0xeb4   : > { %v2158_v52 = vadd.f32 1e-05, %v2156_v50  ;;  %v2157_v53 = vmul.f32 0.03125, %v2155_v51 }
 0xeb6   : > { %3109 = vrsqrt.f32 %v2158_v52  ;;  %v2159_v55 = vadd.f32 1e-05, %v2157_v53 }
 0xeb8   : > { %3111 = vrsqrt.f32 %v2159_v55 }
 0xec0   : > { %v3110_v56 = vpop.eup %3109 }
 0xec1   : > { %v2162_v58 = vmul.f32 %v3110_v56, %v2146_v42 }
 0xec2   : > { %v3112_v59 = vpop.eup %3111 }
 0xec3   : > { %v2170_v60 = vmul.f32 %v2708_v57, %v2162_v58  ;;  %v2163_v18 = vmul.f32 %v3112_v59, %v2147_v44  ;;  %2185 = sbr.rel (%p2710_p13) target bundleno = 4109 (0x100d), region = 180 }
 0xec5   : > { %v2178_v61 = vadd.f32 %v2709_v17, %v2170_v60  ;;  %v2171_v62 = vmul.f32 %v2708_v57, %v2163_v18 }
 0xec7   : > { %2180 = vst.msk [vmem:[#allocation2] sm:$0xff] %vm1227_vm4, %v2178_v61  ;;  %v2179_v63 = vadd.f32 %v2709_v17, %v2171_v62  ;;  %v2194_v3 = vsel (!%p2710_p13), %vm2193_vm13, %v2178_v61, 0.0 }
 0xec9   : > { %2181 = vst.msk [vmem:[#allocation2 + $0x8] sm:$0xff] %vm1227_vm4, %v2179_v63  ;;  %v2190_v0 = vrot.slane (!%p2710_p13), %v2179_v63, 7 }
 0xecb   : > { %v2198_v2 = vsel %vm2197_vm12, %v2190_v0, 0.0 }
 0xecc   : > { %2199 = vadd.xlane.f32.xlu0 %v2198_v2 }
 0xed0   : > { %2195 = vadd.xlane.f32.xlu0 %v2194_v3 }
 0xf59   : > { %v2200_v4 = vpop.xlane.xlu0 %2199 }
 0xf5a   : > { %v2202_v5 = vmul.f32 0.03125, %v2200_v4 }
 0xf5c   : > { %v2205_v6 = vrot.slane %v2202_v5, 1 }
 0xf5d   : > { %v2196_v1 = vpop.xlane.xlu0 %2195 }
 0xf5e   : > { %v2209_v7 = vsub.f32 %v2179_v63, %v2205_v6  ;;  %v2201_v8 = vmul.f32 0.03125, %v2196_v1 }
 0xf60   : > { %v2208_v9 = vsub.f32 %v2178_v61, %v2201_v8  ;;  %v2211_v54 = vmul.f32 %v2209_v7, %v2209_v7 }
 0xf62   : > { %v2210_v10 = vmul.f32 %v2208_v9, %v2208_v9  ;;  %v2214_v11 = vrot.slane %v2211_v54, 7 }
 0xf64   : > { %v2220_v12 = vsel %vm2197_vm12, %v2214_v11, 0.0  ;;  %v2217_v13 = vsel %vm2193_vm13, %v2210_v10, 0.0 }
 0xf65   : > { %2221 = vadd.xlane.f32.xlu1 %v2220_v12 }
 0xf69   : > { %2218 = vadd.xlane.f32.xlu1 %v2217_v13 }
 0xff2   : > { %v2222_v15 = vpop.xlane.xlu1 %2221 }
 0xff3   : > { %v2224_v16 = vmul.f32 0.03125, %v2222_v15 }
 0xff5   : > { %v2226_v19 = vadd.f32 1e-06, %v2224_v16 }
 0xff6   : > { %v2219_v20 = vpop.xlane.xlu1 %2218 }
 0xff7   : > { %3113 = vrsqrt.f32 %v2226_v19  ;;  %v2223_v21 = vmul.f32 0.03125, %v2219_v20 }
 0xff9   : > { %v2225_v49 = vadd.f32 1e-06, %v2223_v21 }
 0xffb   : > { %3115 = vrsqrt.f32 %v2225_v49 }
0x1001   : > { %v3114_v22 = vpop.eup %3113 }
0x1002   : > { %v2231_v23 = vrot.slane %v3114_v22, 1 }
0x1004   : > { %v2235_v25 = vmul.f32 %v2231_v23, %v2209_v7 }
0x1005   : > { %v3116_v26 = vpop.eup %3115 }
0x1006   : > { %v2243_v28 = vmul.f32 %v2711_v24, %v2235_v25  ;;  %v2234_v29 = vmul.f32 %v3116_v26, %v2208_v9 }
0x1008   : > { %v2251_v14 = vadd.f32 %v2712_v27, %v2243_v28  ;;  %v2242_v30 = vmul.f32 %v2711_v24, %v2234_v29 }
0x100a   : > { %2253 = vst.msk [vmem:[#allocation33 - $0x6] sm:$0x80] %vm2193_vm13, %v2251_v14  ;;  %v2250_v31 = vadd.f32 %v2712_v27, %v2242_v30 }
0x100c   : > { %2252 = vst.msk [vmem:[#allocation33 - $0x7] sm:$0x80] %vm2193_vm13, %v2250_v31 }
0x100d PF: > { %s4971_s26 = sld [smem:[#allocation46_spill]]  ;;  %s3821_s23 = smov [#allocation33]  }
0x100e   : > { %s2263_s2 = sshll.u32 %s3821_s23, 4  ;;  %s2264_s2 = int_to_ptr.vmem [resolvable:$true] %s2263_s2 }
0x100f   : > { %s3673_s13 = scalar_lea.vmem %s2264_s2, 32  ;;  %p3680_p3 = scmp.lt.s32.totalorder %s2264_s2, %s2264_s2 }
0x1010   : > { %p3674_p12 = scmp.ne.s32.totalorder %s2264_s2, %s3673_s13  ;;  %p3681_p7 = scmp.lt.s32.totalorder %s3673_s13, %s3673_s13 }
0x1012   : > { %p3682_p6 = por %p3681_p7, %p3680_p3 }
0x1013   : > { %p3000_p2 = scmp.eq.s32.totalorder %s4971_s26, 1 }
0x1015   : > { %p3675_p4 = pnand %p3674_p12, %p3000_p2 }
0x1017   : > { %p3676_p0 = pneg %p3675_p4 }
0x1019   : > { %p3683_p5 = pnand %p3682_p6, %p3676_p0 }
0x101b   : > { %3686 = shalt.err (!%p3683_p5)
}
0x101c   : > { %s4972_s3 = sld [smem:[#allocation68_spill]] }
0x1022   : > { %s3687_s28 = scalar_lea.hbm %s4972_s3, 32 }
0x1023   : > { %p3688_p8 = scmp.ne.s32.totalorder %s4972_s3, %s3687_s28  ;;  %p3693_p1 = scmp.lt.u32.totalorder %s3687_s28, %s4972_s3 }
0x1025   : > { %p3689_p9 = pnand %p3688_p8, %p3000_p2 }
0x1027   : > { %p3690_p11 = pneg %p3689_p9 }
0x1029   : > { %p3695_p10 = pnand %p3693_p1, %p3690_p11 }
0x102b   : > { %3698 = shalt.err (!%p3695_p10)
}
0x102c   : > { %s3822_s18 = smov 1  }
0x102d   : > { %2923 = dma.vmem_to_hbm [thread:$0]  (%p3000_p2), %s2264_s2, 32, %s4972_s3, [#allocation5], %s3820_s24, %s3820_s24, %s3822_s18  }
0x102e   : > { %3764 = dma.done.wait (%p3000_p2), [#allocation5], 32  }
0x102f   : > { %3766 = vsyncadd (%p3000_p2), [#allocation5], 4294967264 }
0x1030 PF: > { %s52_s22 = sadd.s32 1, %s3789_s22   ;;  %s4973_s23 = sld [smem:[#allocation50_spill]] }
0x1031   : > { %p49_p13 = scmp.ge.s32.totalorder %s52_s22, 4   ;;  %s4974_s13 = sld [smem:[#allocation49_spill]] }
0x1032   : > { %s4975_s0 = smov %s3773_s30  ;;  %s4976_s30 = smov %s3777_s20 }
0x1033   : > { %s4978_s21 = smov %s3785_s1  ;;  %51 = sbr.rel (!%p49_p13) target bundleno = 38 (0x26), region = 308 }
0x1036   : > { %s4977_s20 = smov %s4973_s23 }
0x1037   : > { %s4979_s1 = smov %s4974_s13 }
0x103a   :  { %2279 = vsyncpa [#allocation4], 1 }
0x103b   :  { %2281 = vsyncpa [#allocation4 + $0x1], 1 }
0x103c   :  { %2282 = vsyncpa [#allocation7], 1 }
0x103d   :  { %2283 = vsyncpa [#allocation10], 1 }
0x103e   :  { %2284 = vsyncpa [#allocation13], 1 }
0x103f   :  { %2286 = vsyncpa [#allocation13 + $0x1], 1 }
0x1040   :  { %2287 = vsyncpa [#allocation16], 1 }
0x1041   :  { %2289 = vsyncpa [#allocation16 + $0x1], 1 }
0x1042   :  { %2290 = vsyncpa [#allocation19], 1 }
0x1043   :  { %2292 = vsyncpa [#allocation19 + $0x1], 1 }
0x1044   :  { %2293 = vsyncpa [#allocation22], 1 }
0x1045   :  { %2295 = vsyncpa [#allocation22 + $0x1], 1 }
0x1046   :  { %2296 = vsyncpa [#allocation25], 1 }
0x1047   :  { %2298 = vsyncpa [#allocation25 + $0x1], 1 }
0x1048   :  { %2299 = vsyncpa [#allocation28], 1 }
0x1049   :  { %2301 = vsyncpa [#allocation28 + $0x1], 1 }
0x104a   :  { %2302 = vsyncpa [#allocation31], 1 }
0x104b   :  { %2303 = vsyncpa [#allocation5], 1 }
0x104c   :  { %2305 = vsyncpa [#allocation5 + $0x1], 1 }

</bundles_post_ra>
